<compile_context>
chip_gen: v6e
topology: v6e:2x2x1
jax: 0.10.0
libtpu: 0.0.40
codegen_flags: <defaults>
</compile_context>

<pallas_src>
import functools
import math

import jax
import jax.numpy as jnp
from jax import lax
from jax.experimental import pallas as pl
from jax.experimental.pallas import tpu as pltpu

LN_EPS = 1e-5
BN_EPS = 1e-5

_MM_DTYPE = jnp.bfloat16          # MXU operand dtype (accumulation stays f32)
_ROW_TILE_CAP = 1024              # row tile for the standalone linear / LN kernels

# Row layout of the packed per-layer "vecs" array (each row is a length-D vector).
FF1_G, FF1_B, FF1_B2 = 0, 1, 2
MHA_G, MHA_B, MHA_BQ, MHA_BK, MHA_BV, MHA_BO = 3, 4, 5, 6, 7, 8
CV_G, CV_B = 9, 10
CV_BPW1A, CV_BPW1B = 11, 12
CV_DW_PREV, CV_DW_CUR, CV_DW_NEXT, CV_BDW = 13, 14, 15, 16
CV_BN_G, CV_BN_B, CV_BN_M, CV_BN_V = 17, 18, 19, 20
CV_BPW2 = 21
FF2_G, FF2_B, FF2_B2 = 22, 23, 24
BLK_G, BLK_B = 25, 26
OUT_G, OUT_B = 27, 28
N_VEC = 29


# ---------------------------------------------------------------------------
# generation-aware VMEM limit
# ---------------------------------------------------------------------------
_VMEM_LIMIT_CACHE = [None]


def _vmem_limit_bytes():
    if _VMEM_LIMIT_CACHE[0] is None:
        try:
            cap = int(pltpu.get_tpu_info().vmem_capacity_bytes)
        except Exception:
            cap = 128 * 1024 * 1024
        # ~75% of physical: 48 MiB on v7x (64 MiB), 96 MiB on v5e/v6e (128 MiB)
        _VMEM_LIMIT_CACHE[0] = max(32 << 20, min(100 << 20, (cap * 3) // 4))
    return _VMEM_LIMIT_CACHE[0]


# ---------------------------------------------------------------------------
# shared math helpers (pure jnp: usable inside kernels and in the reference)
# ---------------------------------------------------------------------------
def _mm(a, w):
    """Matmul on the MXU: bf16 operands, f32 accumulation."""
    return jnp.dot(a.astype(_MM_DTYPE), w.astype(_MM_DTYPE),
                   preferred_element_type=jnp.float32)


def _bmm(eq, a, b):
    """Batched (leading batch dim) einsum on the MXU: bf16 in, f32 out."""
    return jnp.einsum(eq, a.astype(_MM_DTYPE), b.astype(_MM_DTYPE),
                      preferred_element_type=jnp.float32)


def _layernorm(x, g, b):
    mu = jnp.mean(x, axis=-1, keepdims=True)
    var = jnp.mean(jnp.square(x - mu), axis=-1, keepdims=True)
    return (x - mu) * lax.rsqrt(var + LN_EPS) * g + b


def _swish(x):
    return x * jax.nn.sigmoid(x)


# ---------------------------------------------------------------------------
# fused whole-encoder (all layers) Conformer kernel
# ---------------------------------------------------------------------------
def conformer_stack_kernel(x_ref, vecs_ref, ffb1_ref, ffw1_ref, ffw2_ref,
                           wqkv_ref, wo_ref, pw1_ref, pw2_ref,
                           o_ref, acc_ref, *, n_head):
    layer = pl.program_id(1)
    n_layers = pl.num_programs(1)

    # Load the activation into the VMEM carry at the first layer of each batch.
    @pl.when(layer == 0)
    def _():
        acc_ref[...] = x_ref[0]

    x = acc_ref[...]                               # (L, D) f32, layer-resident
    L, D = x.shape
    nh = n_head
    dh = D // nh

    V = vecs_ref[0]                                # (N_VEC, D) packed vectors
    row = lambda i: V[i:i + 1]                     # (1, D)
    B1 = ffb1_ref[0]                               # (2, H) FF hidden biases

    def ff_module(z, wi, gi, bi, b2i):
        # Residual(FFModule, half=True): z + 0.5 * W2(swish(W1(LN(z))))
        y = _layernorm(z, row(gi), row(bi))
        h = _mm(y, ffw1_ref[0, wi]) + B1[wi:wi + 1]
        h = _swish(h)
        return z + 0.5 * (_mm(h, ffw2_ref[0, wi]) + row(b2i))

    # --- FF module 1 (half residual) ----------------------------------------
    x = ff_module(x, 0, FF1_G, FF1_B, FF1_B2)

    # --- MHA module (residual) -----------------------------------------------
    # Single full-width (L,D)x(D,3D) projection; 1/sqrt(dh) already folded into
    # Wq / bq at pack time.
    y = _layernorm(x, row(MHA_G), row(MHA_B))
    qkv_bias = jnp.concatenate([row(MHA_BQ), row(MHA_BK), row(MHA_BV)], axis=1)
    qkv = _mm(y, wqkv_ref[0]) + qkv_bias                               # (L, 3D)
    q = jnp.stack([qkv[:, h * dh:(h + 1) * dh] for h in range(nh)], axis=0)
    k = jnp.stack([qkv[:, D + h * dh:D + (h + 1) * dh] for h in range(nh)], axis=0)
    v = jnp.stack([qkv[:, 2 * D + h * dh:2 * D + (h + 1) * dh] for h in range(nh)], axis=0)
    # TODO(synk): tile the KV axis flash-attention style for long L (bounds the
    #             (nh, L, L) score VMEM; critical on v7x's 64 MiB VMEM).
    s = _bmm('hqe,hke->hqk', q, k)                                     # (nh, L, L)
    s = s - jnp.max(s, axis=-1, keepdims=True)
    p = jnp.exp(s)
    p = p * pl.reciprocal(jnp.sum(p, axis=-1, keepdims=True), approx=True)
    ctx = _bmm('hqk,hke->hqe', p, v)                                   # (nh, L, dh)
    ctx2d = jnp.concatenate([ctx[h] for h in range(nh)], axis=1)       # (L, D)
    x = x + _mm(ctx2d, wo_ref[0]) + row(MHA_BO)

    # --- Conv module (residual) ----------------------------------------------
    # LN -> pointwise conv (D->2D) -> GLU -> depthwise conv (k=3, pad=1)
    #    -> BatchNorm (eval) -> Swish -> pointwise conv (D->D)
    y = _layernorm(x, row(CV_G), row(CV_B))
    h = _mm(y, pw1_ref[0])                                             # (L, 2D)
    a = h[:, :D] + row(CV_BPW1A)
    g = h[:, D:] + row(CV_BPW1B)
    u = a * jax.nn.sigmoid(g)                                          # GLU
    t = lax.broadcasted_iota(jnp.int32, (L, 1), 0)
    u_prev = jnp.where(t == 0, 0.0, pltpu.roll(u, 1, 0))          # u[i-1], 0 at i=0
    u_next = jnp.where(t == L - 1, 0.0, pltpu.roll(u, L - 1, 0))  # u[i+1], 0 at i=L-1
    c = (u_prev * row(CV_DW_PREV) + u * row(CV_DW_CUR)
         + u_next * row(CV_DW_NEXT) + row(CV_BDW))
    c = ((c - row(CV_BN_M)) * lax.rsqrt(row(CV_BN_V) + BN_EPS)
         * row(CV_BN_G) + row(CV_BN_B))                                # BatchNorm1d eval
    c = _swish(c)
    x = x + _mm(c, pw2_ref[0]) + row(CV_BPW2)

    # --- FF module 2 (half residual) + block LayerNorm ------------------------
    x = ff_module(x, 1, FF2_G, FF2_B, FF2_B2)
    x = _layernorm(x, row(BLK_G), row(BLK_B))
    acc_ref[...] = x                                                    # carry to next layer

    # Encoder-level lnorm_out fused into the last layer; only write HBM once.
    @pl.when(layer == n_layers - 1)
    def _():
        o_ref[0] = _layernorm(x, row(OUT_G), row(OUT_B)).astype(o_ref.dtype)


def conformer_stack_pallas(x, st, *, n_head):
    B, L, D = x.shape
    n_layers, _, H = st["ffb1"].shape

    def lspec(*shape):
        nd = len(shape)
        return pl.BlockSpec((1,) + tuple(shape),
                            lambda b, l, _nd=nd: (l,) + (0,) * _nd)

    x_spec = pl.BlockSpec((1, L, D), lambda b, l: (b, 0, 0))

    return pl.pallas_call(
        functools.partial(conformer_stack_kernel, n_head=n_head),
        out_shape=jax.ShapeDtypeStruct((B, L, D), jnp.float32),
        grid=(B, n_layers),
        in_specs=[
            x_spec,
            lspec(N_VEC, D),          # packed per-feature vectors (f32)
            lspec(2, H),              # FF1 / FF2 hidden biases    (f32)
            lspec(2, D, H),           # FF1 / FF2 first weights    (bf16)
            lspec(2, H, D),           # FF1 / FF2 second weights   (bf16)
            lspec(D, 3 * D),          # fused Wqkv (scale folded)  (bf16)
            lspec(D, D),              # Wo                         (bf16)
            lspec(D, 2 * D),          # pointwise conv 1           (bf16)
            lspec(D, D),              # pointwise conv 2           (bf16)
        ],
        out_specs=x_spec,
        scratch_shapes=[pltpu.VMEM((L, D), jnp.float32)],   # layer-resident activation
        compiler_params=pltpu.CompilerParams(
            dimension_semantics=("parallel", "arbitrary"),
            vmem_limit_bytes=_vmem_limit_bytes()),
    )(x, st["vecs"], st["ffb1"], st["ffw1"], st["ffw2"],
      st["wqkv"], st["wo"], st["pw1"], st["pw2"])


# ---------------------------------------------------------------------------
# row-tiled input linear (and degenerate-case LayerNorm) kernels
# ---------------------------------------------------------------------------
def linear_kernel(x_ref, w_ref, b_ref, o_ref):
    o_ref[...] = _mm(x_ref[...], w_ref[...]) + b_ref[...]


def linear_pallas(x, w, b):
    N, Din = x.shape
    Dout = w.shape[1]
    tm = min(N, _ROW_TILE_CAP)
    return pl.pallas_call(
        linear_kernel,
        out_shape=jax.ShapeDtypeStruct((N, Dout), jnp.float32),
        grid=(pl.cdiv(N, tm),),
        in_specs=[pl.BlockSpec((tm, Din), lambda i: (i, 0)),
                  pl.BlockSpec((Din, Dout), lambda i: (0, 0)),
                  pl.BlockSpec((1, Dout), lambda i: (0, 0))],
        out_specs=pl.BlockSpec((tm, Dout), lambda i: (i, 0)),
        compiler_params=pltpu.CompilerParams(
            dimension_semantics=("parallel",),
            vmem_limit_bytes=_vmem_limit_bytes()),
    )(x, w, b)


def layernorm_kernel(x_ref, g_ref, b_ref, o_ref):
    o_ref[...] = _layernorm(x_ref[...], g_ref[...], b_ref[...])


def layernorm_pallas(x, g, b):
    # Only used for the degenerate n_layers == 0 case (otherwise fused).
    N, D = x.shape
    tm = min(N, _ROW_TILE_CAP)
    return pl.pallas_call(
        layernorm_kernel,
        out_shape=jax.ShapeDtypeStruct((N, D), jnp.float32),
        grid=(pl.cdiv(N, tm),),
        in_specs=[pl.BlockSpec((tm, D), lambda i: (i, 0)),
                  pl.BlockSpec((1, D), lambda i: (0, 0)),
                  pl.BlockSpec((1, D), lambda i: (0, 0))],
        out_specs=pl.BlockSpec((tm, D), lambda i: (i, 0)),
        compiler_params=pltpu.CompilerParams(
            dimension_semantics=("parallel",),
            vmem_limit_bytes=_vmem_limit_bytes()),
    )(x, g, b)


# ---------------------------------------------------------------------------
# parameter construction (deterministic synthetic init) and packing
# ---------------------------------------------------------------------------
def init_params(seed, idim, n_units, n_layers, ff_hsize, n_head, kernel_size=3):
    assert kernel_size == 3, "kernel implemented for the default kernel_size=3"
    assert n_units % n_head == 0
    key = jax.random.PRNGKey(seed)

    def nxt():
        nonlocal key
        key, sub = jax.random.split(key)
        return sub

    def w(shape, scale=0.05):
        return jax.random.normal(nxt(), shape, jnp.float32) * scale

    D, H = n_units, ff_hsize
    ones = lambda s: jnp.ones(s, jnp.float32)

    def ff_params():
        return dict(g=ones((1, D)) + w((1, D)), b=w((1, D)),
                    w1=w((D, H)), b1=w((1, H)),
                    w2=w((H, D)), b2=w((1, D)))

    def mha_params():
        return dict(g=ones((1, D)) + w((1, D)), b=w((1, D)),
                    wq=w((D, D)), bq=w((1, D)),
                    wk=w((D, D)), bk=w((1, D)),
                    wv=w((D, D)), bv=w((1, D)),
                    wo=w((D, D)), bo=w((1, D)))

    def conv_params():
        return dict(g=ones((1, D)) + w((1, D)), b=w((1, D)),
                    w_pw1=w((D, 2 * D)), b_pw1=w((1, 2 * D)),
                    dw0=w((1, D)), dw1=w((1, D)), dw2=w((1, D)), b_dw=w((1, D)),
                    bn_g=ones((1, D)) + w((1, D)), bn_b=w((1, D)),
                    bn_m=w((1, D)), bn_v=ones((1, D)) + jnp.abs(w((1, D))),
                    w_pw2=w((D, D)), b_pw2=w((1, D)))

    return {
        "linear_in": (w((idim, D)), w((1, D))),
        "layers": [dict(ff1=ff_params(), mha=mha_params(), conv=conv_params(),
                        ff2=ff_params(),
                        ln_g=ones((1, D)) + w((1, D)), ln_b=w((1, D)))
                   for _ in range(n_layers)],
        "lnorm_out": (ones((1, D)) + w((1, D)), w((1, D))),
    }


def pack_params(params, *, n_head):
    """Pack/stack per-layer params into the fused-kernel operands (bf16 weights)."""
    layers = params["layers"]
    out_g, out_b = params["lnorm_out"]
    w_in, b_in = params["linear_in"]
    packed = {"linear_in": (w_in.astype(_MM_DTYPE), b_in),
              "lnorm_out": params["lnorm_out"],
              "layers": None}
    if not layers:
        return packed

    n_layers = len(layers)
    vecs_l, ffb1_l, ffw1_l, ffw2_l, wqkv_l, wo_l, pw1_l, pw2_l = ([] for _ in range(8))
    for li, lp in enumerate(layers):
        ff1, ff2, mha, cv = lp["ff1"], lp["ff2"], lp["mha"], lp["conv"]
        D = mha["wq"].shape[0]
        dh = D // n_head
        scale = 1.0 / math.sqrt(dh)
        is_last = li == n_layers - 1
        og = out_g if is_last else jnp.ones((1, D), jnp.float32)
        ob = out_b if is_last else jnp.zeros((1, D), jnp.float32)

        rows = [None] * N_VEC
        rows[FF1_G], rows[FF1_B], rows[FF1_B2] = ff1["g"], ff1["b"], ff1["b2"]
        rows[MHA_G], rows[MHA_B] = mha["g"], mha["b"]
        rows[MHA_BQ] = mha["bq"] * scale               # attention scale folded into bq
        rows[MHA_BK], rows[MHA_BV], rows[MHA_BO] = mha["bk"], mha["bv"], mha["bo"]
        rows[CV_G], rows[CV_B] = cv["g"], cv["b"]
        rows[CV_BPW1A], rows[CV_BPW1B] = cv["b_pw1"][:, :D], cv["b_pw1"][:, D:]
        rows[CV_DW_PREV], rows[CV_DW_CUR], rows[CV_DW_NEXT] = cv["dw0"], cv["dw1"], cv["dw2"]
        rows[CV_BDW] = cv["b_dw"]
        rows[CV_BN_G], rows[CV_BN_B] = cv["bn_g"], cv["bn_b"]
        rows[CV_BN_M], rows[CV_BN_V] = cv["bn_m"], cv["bn_v"]
        rows[CV_BPW2] = cv["b_pw2"]
        rows[FF2_G], rows[FF2_B], rows[FF2_B2] = ff2["g"], ff2["b"], ff2["b2"]
        rows[BLK_G], rows[BLK_B] = lp["ln_g"], lp["ln_b"]
        rows[OUT_G], rows[OUT_B] = og, ob
        vecs_l.append(jnp.concatenate([r.reshape(1, D) for r in rows], axis=0))

        ffb1_l.append(jnp.concatenate([ff1["b1"], ff2["b1"]], axis=0))
        ffw1_l.append(jnp.stack([ff1["w1"], ff2["w1"]], axis=0).astype(_MM_DTYPE))
        ffw2_l.append(jnp.stack([ff1["w2"], ff2["w2"]], axis=0).astype(_MM_DTYPE))
        wqkv_l.append(jnp.concatenate([mha["wq"] * scale, mha["wk"], mha["wv"]],
                                      axis=1).astype(_MM_DTYPE))
        wo_l.append(mha["wo"].astype(_MM_DTYPE))
        pw1_l.append(cv["w_pw1"].astype(_MM_DTYPE))
        pw2_l.append(cv["w_pw2"].astype(_MM_DTYPE))

    packed["layers"] = dict(
        vecs=jnp.stack(vecs_l), ffb1=jnp.stack(ffb1_l),
        ffw1=jnp.stack(ffw1_l), ffw2=jnp.stack(ffw2_l),
        wqkv=jnp.stack(wqkv_l), wo=jnp.stack(wo_l),
        pw1=jnp.stack(pw1_l), pw2=jnp.stack(pw2_l))
    return packed


# ---------------------------------------------------------------------------
# full ConformerEncoder forward (Pallas)
# ---------------------------------------------------------------------------
def conformer_encoder_forward(x, packed, *, n_head):
    B, L, _ = x.shape
    w_in, b_in = packed["linear_in"]
    D = w_in.shape[1]
    e = linear_pallas(x.reshape(B * L, -1), w_in, b_in).reshape(B, L, D)
    st = packed["layers"]
    if st is None:
        return layernorm_pallas(e.reshape(B * L, D), *packed["lnorm_out"])
    e = conformer_stack_pallas(e, st, n_head=n_head)
    return e.reshape(B * L, D)   # (B*T, n_units), lnorm_out already fused in


# ---------------------------------------------------------------------------
# pure-JAX reference (same math, used for in-script validation)
# ---------------------------------------------------------------------------
def reference_forward(x, params, *, n_head):
    B, L, _ = x.shape
    w_in, b_in = params["linear_in"]
    D = w_in.shape[1]
    nh = n_head
    dh = D // nh
    e = (_mm(x.reshape(B * L, -1), w_in) + b_in).reshape(B, L, D)

    def ff(z, p):
        y = _layernorm(z, p["g"], p["b"])
        h = _mm(y, p["w1"]) + p["b1"]
        h = h * jax.nn.sigmoid(h)
        return z + 0.5 * (_mm(h, p["w2"]) + p["b2"])

    for lp in params["layers"]:
        e = ff(e, lp["ff1"])

        p = lp["mha"]
        y = _layernorm(e, p["g"], p["b"])
        q = ((_mm(y, p["wq"]) + p["bq"]) / math.sqrt(dh)).reshape(B, L, nh, dh)
        k = (_mm(y, p["wk"]) + p["bk"]).reshape(B, L, nh, dh)
        v = (_mm(y, p["wv"]) + p["bv"]).reshape(B, L, nh, dh)
        s = jnp.einsum('blhd,bmhd->bhlm', q.astype(_MM_DTYPE), k.astype(_MM_DTYPE),
                       preferred_element_type=jnp.float32)
        a = jax.nn.softmax(s, axis=-1)
        ctx = jnp.einsum('bhlm,bmhd->blhd', a.astype(_MM_DTYPE), v.astype(_MM_DTYPE),
                         preferred_element_type=jnp.float32).reshape(B, L, D)
        e = e + _mm(ctx, p["wo"]) + p["bo"]

        p = lp["conv"]
        y = _layernorm(e, p["g"], p["b"])
        h = _mm(y, p["w_pw1"]) + p["b_pw1"]
        u = h[..., :D] * jax.nn.sigmoid(h[..., D:])
        zero = jnp.zeros_like(u[:, :1])
        u_prev = jnp.concatenate([zero, u[:, :-1]], axis=1)
        u_next = jnp.concatenate([u[:, 1:], zero], axis=1)
        c = u_prev * p["dw0"] + u * p["dw1"] + u_next * p["dw2"] + p["b_dw"]
        c = (c - p["bn_m"]) * lax.rsqrt(p["bn_v"] + BN_EPS) * p["bn_g"] + p["bn_b"]
        c = c * jax.nn.sigmoid(c)
        e = e + _mm(c, p["w_pw2"]) + p["b_pw2"]

        e = ff(e, lp["ff2"])
        e = _layernorm(e, lp["ln_g"], lp["ln_b"])

    g, b = params["lnorm_out"]
    return _layernorm(e.reshape(B * L, D), g, b)


# ---------------------------------------------------------------------------
if __name__ == "__main__":
    # Small, lane-friendly shapes: D = 128 (one full lane tile, 2D = 256 keeps
    # the GLU split lane-aligned), L multiple of 8.
    B, L, idim = 2, 8, 16
    n_units, n_layers, ff_hsize, n_head, kernel_size = 128, 2, 256, 4, 3

    params = init_params(seed=0, idim=idim, n_units=n_units, n_layers=n_layers,
                         ff_hsize=ff_hsize, n_head=n_head, kernel_size=kernel_size)
    packed = pack_params(params, n_head=n_head)

    x = jax.random.normal(jax.random.PRNGKey(0), (B, L, idim), jnp.float32)

    fwd = jax.jit(functools.partial(conformer_encoder_forward, n_head=n_head))
    out = jax.block_until_ready(fwd(x, packed))

    assert out.shape == (B * L, n_units), out.shape
    assert bool(jnp.all(jnp.isfinite(out)))

    # validate against a pure-JAX reference of the same forward pass
    ref = jax.block_until_ready(reference_forward(x, params, n_head=n_head))
    err = float(jnp.max(jnp.abs(out - ref)))
    assert err < 2e-2, f"max |pallas - reference| = {err}"

    print("KERNEL_OK")
</pallas_src>

<mosaic_0001>
module attributes {stable_mosaic.version = 11 : i64} {
  func.func @linear_kernel(%arg0: i32, %arg1: memref<16x16xf32, #tpu.memory_space<vmem>>, %arg2: memref<16x128xbf16, #tpu.memory_space<vmem>>, %arg3: memref<1x128xf32, #tpu.memory_space<vmem>>, %arg4: memref<16x128xf32, #tpu.memory_space<vmem>>) attributes {dimension_semantics = [#tpu.dimension_semantics<parallel>], iteration_bounds = array<i64: 1>, scalar_prefetch = 0 : i64, scratch_operands = 0 : i64, tpu.core_type = #tpu.core_type<tc>, window_params = [{transform_indices = @transform_0, window_bounds = array<i64: 16, 16>}, {pipeline_mode = #tpu.pipeline_mode<synchronous>, transform_indices = @transform_1, window_bounds = array<i64: 16, 128>}, {pipeline_mode = #tpu.pipeline_mode<synchronous>, transform_indices = @transform_2, window_bounds = array<i64: 1, 128>}, {transform_indices = @transform_3, window_bounds = array<i64: 16, 128>}]} {
    %c0 = arith.constant 0 : index
    %c0_0 = arith.constant 0 : index
    %0 = vector.load %arg1[%c0, %c0_0] : memref<16x16xf32, #tpu.memory_space<vmem>>, vector<16x16xf32>
    %c0_1 = arith.constant 0 : index
    %c0_2 = arith.constant 0 : index
    %1 = vector.load %arg2[%c0_1, %c0_2] : memref<16x128xbf16, #tpu.memory_space<vmem>>, vector<16x128xbf16>
    %2 = arith.truncf %0 : vector<16x16xf32> to vector<16x16xbf16>
    %cst = arith.constant dense<0.000000e+00> : vector<16x128xf32>
    %3 = tpu.matmul %2, %1, %cst {dimension_numbers = #tpu.dot_dimension_numbers<[1], [0], [0], [1], [0, 0, 1, 1], [], []>} : vector<16x16xbf16>, vector<16x128xbf16>, vector<16x128xf32> -> vector<16x128xf32>
    %c0_3 = arith.constant 0 : index
    %c0_4 = arith.constant 0 : index
    %4 = vector.load %arg3[%c0_3, %c0_4] : memref<1x128xf32, #tpu.memory_space<vmem>>, vector<1x128xf32>
    %5 = vector.broadcast %4 : vector<1x128xf32> to vector<16x128xf32>
    %6 = arith.addf %3, %5 : vector<16x128xf32>
    %c0_5 = arith.constant 0 : index
    %c0_6 = arith.constant 0 : index
    %7 = vector.load %arg4[%c0_5, %c0_6] : memref<16x128xf32, #tpu.memory_space<vmem>>, vector<16x128xf32>
    tpu.vector_store %arg4[%c0_5, %c0_6], %6 {strides = array<i32>} : memref<16x128xf32, #tpu.memory_space<vmem>>, vector<16x128xf32>,
    return
  }
  func.func @transform_0(%arg0: i32) -> (i32, i32) {
    %c0_i32 = arith.constant 0 : i32
    %c0_i32_0 = arith.constant 0 : i32
    return %arg0, %c0_i32 : i32, i32
  }
  func.func @transform_1(%arg0: i32) -> (i32, i32) {
    %c0_i32 = arith.constant 0 : i32
    %c0_i32_0 = arith.constant 0 : i32
    %c0_i32_1 = arith.constant 0 : i32
    return %c0_i32, %c0_i32_0 : i32, i32
  }
  func.func @transform_2(%arg0: i32) -> (i32, i32) {
    %c0_i32 = arith.constant 0 : i32
    %c0_i32_0 = arith.constant 0 : i32
    %c0_i32_1 = arith.constant 0 : i32
    return %c0_i32, %c0_i32_0 : i32, i32
  }
  func.func @transform_3(%arg0: i32) -> (i32, i32) {
    %c0_i32 = arith.constant 0 : i32
    %c0_i32_0 = arith.constant 0 : i32
    return %arg0, %c0_i32 : i32, i32
  }
}

module attributes {stable_mosaic.version = 11 : i64} {
  func.func @conformer_stack_kernel(%arg0: i32, %arg1: i32, %arg2: memref<1x8x128xf32, #tpu.memory_space<vmem>>, %arg3: memref<1x29x128xf32, #tpu.memory_space<vmem>>, %arg4: memref<1x2x256xf32, #tpu.memory_space<vmem>>, %arg5: memref<1x2x128x256xbf16, #tpu.memory_space<vmem>>, %arg6: memref<1x2x256x128xbf16, #tpu.memory_space<vmem>>, %arg7: memref<1x128x384xbf16, #tpu.memory_space<vmem>>, %arg8: memref<1x128x128xbf16, #tpu.memory_space<vmem>>, %arg9: memref<1x128x256xbf16, #tpu.memory_space<vmem>>, %arg10: memref<1x128x128xbf16, #tpu.memory_space<vmem>>, %arg11: memref<1x8x128xf32, #tpu.memory_space<vmem>>, %arg12: memref<8x128xf32, #tpu.memory_space<vmem>>) attributes {dimension_semantics = [#tpu.dimension_semantics<parallel>, #tpu.dimension_semantics<arbitrary>], iteration_bounds = array<i64: 2, 2>, scalar_prefetch = 0 : i64, scratch_operands = 1 : i64, tpu.core_type = #tpu.core_type<tc>, window_params = [{transform_indices = @transform_0, window_bounds = array<i64: 1, 8, 128>}, {transform_indices = @transform_1, window_bounds = array<i64: 1, 29, 128>}, {transform_indices = @transform_2, window_bounds = array<i64: 1, 2, 256>}, {transform_indices = @transform_3, window_bounds = array<i64: 1, 2, 128, 256>}, {transform_indices = @transform_4, window_bounds = array<i64: 1, 2, 256, 128>}, {transform_indices = @transform_5, window_bounds = array<i64: 1, 128, 384>}, {transform_indices = @transform_6, window_bounds = array<i64: 1, 128, 128>}, {transform_indices = @transform_7, window_bounds = array<i64: 1, 128, 256>}, {transform_indices = @transform_8, window_bounds = array<i64: 1, 128, 128>}, {transform_indices = @transform_9, window_bounds = array<i64: 1, 8, 128>}]} {
    %c0_i32 = arith.constant 0 : i32
    %0 = arith.cmpi eq, %arg1, %c0_i32 : i32
    %1 = arith.extui %0 : i1 to i32
    %c0_i32_0 = arith.constant 0 : i32
    %2 = arith.cmpi ne, %1, %c0_i32_0 : i32
    scf.if %2 {
      %c0_86 = arith.constant 0 : index
      %c0_87 = arith.constant 0 : index
      %c0_88 = arith.constant 0 : index
      %324 = vector.load %arg2[%c0_86, %c0_87, %c0_88] : memref<1x8x128xf32, #tpu.memory_space<vmem>>, vector<1x8x128xf32>
      %325 = vector.shape_cast %324 : vector<1x8x128xf32> to vector<8x128xf32>
      %c0_89 = arith.constant 0 : index
      %c0_90 = arith.constant 0 : index
      %326 = vector.load %arg12[%c0_89, %c0_90] : memref<8x128xf32, #tpu.memory_space<vmem>>, vector<8x128xf32>
      tpu.vector_store %arg12[%c0_89, %c0_90], %325 {strides = array<i32>} : memref<8x128xf32, #tpu.memory_space<vmem>>, vector<8x128xf32>,
    } else {
    }
    %c0 = arith.constant 0 : index
    %c0_1 = arith.constant 0 : index
    %3 = vector.load %arg12[%c0, %c0_1] : memref<8x128xf32, #tpu.memory_space<vmem>>, vector<8x128xf32>
    %c0_2 = arith.constant 0 : index
    %c0_3 = arith.constant 0 : index
    %c0_4 = arith.constant 0 : index
    %4 = vector.load %arg3[%c0_2, %c0_3, %c0_4] : memref<1x29x128xf32, #tpu.memory_space<vmem>>, vector<1x29x128xf32>
    %5 = vector.shape_cast %4 : vector<1x29x128xf32> to vector<29x128xf32>
    %c0_5 = arith.constant 0 : index
    %c0_6 = arith.constant 0 : index
    %c0_7 = arith.constant 0 : index
    %6 = vector.load %arg4[%c0_5, %c0_6, %c0_7] : memref<1x2x256xf32, #tpu.memory_space<vmem>>, vector<1x2x256xf32>
    %7 = vector.shape_cast %6 : vector<1x2x256xf32> to vector<2x256xf32>
    %8 = vector.extract_strided_slice %5 {offsets = [0, 0], sizes = [1, 128], strides = [1, 1]} : vector<29x128xf32> to vector<1x128xf32>
    %9 = vector.extract_strided_slice %5 {offsets = [1, 0], sizes = [1, 128], strides = [1, 1]} : vector<29x128xf32> to vector<1x128xf32>
    %cst = arith.constant dense<0.000000e+00> : vector<8xf32>
    %10 = vector.multi_reduction <add>, %3, %cst [1] : vector<8x128xf32> to vector<8xf32>
    %11 = vector.shape_cast %10 : vector<8xf32> to vector<8x1xf32>
    %cst_8 = arith.constant 1.280000e+02 : f32
    %12 = vector.broadcast %cst_8 : f32 to vector<8x1xf32>
    %13 = arith.divf %11, %12 : vector<8x1xf32>
    %14 = vector.broadcast %13 : vector<8x1xf32> to vector<8x128xf32>
    %15 = arith.subf %3, %14 : vector<8x128xf32>
    %16 = arith.mulf %15, %15 : vector<8x128xf32>
    %cst_9 = arith.constant dense<0.000000e+00> : vector<8xf32>
    %17 = vector.multi_reduction <add>, %16, %cst_9 [1] : vector<8x128xf32> to vector<8xf32>
    %18 = vector.shape_cast %17 : vector<8xf32> to vector<8x1xf32>
    %cst_10 = arith.constant 1.280000e+02 : f32
    %19 = vector.broadcast %cst_10 : f32 to vector<8x1xf32>
    %20 = arith.divf %18, %19 : vector<8x1xf32>
    %21 = vector.broadcast %13 : vector<8x1xf32> to vector<8x128xf32>
    %22 = arith.subf %3, %21 : vector<8x128xf32>
    %cst_11 = arith.constant 9.99999974E-6 : f32
    %23 = vector.broadcast %cst_11 : f32 to vector<8x1xf32>
    %24 = arith.addf %20, %23 : vector<8x1xf32>
    %25 = math.rsqrt %24 : vector<8x1xf32>
    %26 = vector.broadcast %25 : vector<8x1xf32> to vector<8x128xf32>
    %27 = arith.mulf %22, %26 : vector<8x128xf32>
    %28 = vector.broadcast %8 : vector<1x128xf32> to vector<8x128xf32>
    %29 = arith.mulf %27, %28 : vector<8x128xf32>
    %30 = vector.broadcast %9 : vector<1x128xf32> to vector<8x128xf32>
    %31 = arith.addf %29, %30 : vector<8x128xf32>
    %c0_12 = arith.constant 0 : index
    %c0_13 = arith.constant 0 : index
    %c0_14 = arith.constant 0 : index
    %c0_15 = arith.constant 0 : index
    %32 = vector.load %arg5[%c0_12, %c0_13, %c0_14, %c0_15] : memref<1x2x128x256xbf16, #tpu.memory_space<vmem>>, vector<1x1x128x256xbf16>
    %33 = vector.shape_cast %32 : vector<1x1x128x256xbf16> to vector<128x256xbf16>
    %34 = arith.truncf %31 : vector<8x128xf32> to vector<8x128xbf16>
    %cst_16 = arith.constant dense<0.000000e+00> : vector<8x256xf32>
    %35 = tpu.matmul %34, %33, %cst_16 {dimension_numbers = #tpu.dot_dimension_numbers<[1], [0], [0], [1], [0, 0, 1, 1], [], []>} : vector<8x128xbf16>, vector<128x256xbf16>, vector<8x256xf32> -> vector<8x256xf32>
    %36 = vector.extract_strided_slice %7 {offsets = [0, 0], sizes = [1, 256], strides = [1, 1]} : vector<2x256xf32> to vector<1x256xf32>
    %37 = vector.broadcast %36 : vector<1x256xf32> to vector<8x256xf32>
    %38 = arith.addf %35, %37 : vector<8x256xf32>
    %39 = arith.negf %38 : vector<8x256xf32>
    %40 = math.exp %39 : vector<8x256xf32>
    %cst_17 = arith.constant 1.000000e+00 : f32
    %41 = vector.broadcast %cst_17 : f32 to vector<8x256xf32>
    %42 = arith.addf %41, %40 : vector<8x256xf32>
    %43 = arith.divf %41, %42 : vector<8x256xf32>
    %44 = arith.mulf %38, %43 : vector<8x256xf32>
    %c0_18 = arith.constant 0 : index
    %c0_19 = arith.constant 0 : index
    %c0_20 = arith.constant 0 : index
    %c0_21 = arith.constant 0 : index
    %45 = vector.load %arg6[%c0_18, %c0_19, %c0_20, %c0_21] : memref<1x2x256x128xbf16, #tpu.memory_space<vmem>>, vector<1x1x256x128xbf16>
    %46 = vector.shape_cast %45 : vector<1x1x256x128xbf16> to vector<256x128xbf16>
    %47 = arith.truncf %44 : vector<8x256xf32> to vector<8x256xbf16>
    %cst_22 = arith.constant dense<0.000000e+00> : vector<8x128xf32>
    %48 = tpu.matmul %47, %46, %cst_22 {dimension_numbers = #tpu.dot_dimension_numbers<[1], [0], [0], [1], [0, 0, 1, 1], [], []>} : vector<8x256xbf16>, vector<256x128xbf16>, vector<8x128xf32> -> vector<8x128xf32>
    %49 = vector.extract_strided_slice %5 {offsets = [2, 0], sizes = [1, 128], strides = [1, 1]} : vector<29x128xf32> to vector<1x128xf32>
    %50 = vector.broadcast %49 : vector<1x128xf32> to vector<8x128xf32>
    %51 = arith.addf %48, %50 : vector<8x128xf32>
    %cst_23 = arith.constant 5.000000e-01 : f32
    %52 = vector.broadcast %cst_23 : f32 to vector<8x128xf32>
    %53 = arith.mulf %52, %51 : vector<8x128xf32>
    %54 = arith.addf %3, %53 : vector<8x128xf32>
    %55 = vector.extract_strided_slice %5 {offsets = [3, 0], sizes = [1, 128], strides = [1, 1]} : vector<29x128xf32> to vector<1x128xf32>
    %56 = vector.extract_strided_slice %5 {offsets = [4, 0], sizes = [1, 128], strides = [1, 1]} : vector<29x128xf32> to vector<1x128xf32>
    %cst_24 = arith.constant dense<0.000000e+00> : vector<8xf32>
    %57 = vector.multi_reduction <add>, %54, %cst_24 [1] : vector<8x128xf32> to vector<8xf32>
    %58 = vector.shape_cast %57 : vector<8xf32> to vector<8x1xf32>
    %cst_25 = arith.constant 1.280000e+02 : f32
    %59 = vector.broadcast %cst_25 : f32 to vector<8x1xf32>
    %60 = arith.divf %58, %59 : vector<8x1xf32>
    %61 = vector.broadcast %60 : vector<8x1xf32> to vector<8x128xf32>
    %62 = arith.subf %54, %61 : vector<8x128xf32>
    %63 = arith.mulf %62, %62 : vector<8x128xf32>
    %cst_26 = arith.constant dense<0.000000e+00> : vector<8xf32>
    %64 = vector.multi_reduction <add>, %63, %cst_26 [1] : vector<8x128xf32> to vector<8xf32>
    %65 = vector.shape_cast %64 : vector<8xf32> to vector<8x1xf32>
    %cst_27 = arith.constant 1.280000e+02 : f32
    %66 = vector.broadcast %cst_27 : f32 to vector<8x1xf32>
    %67 = arith.divf %65, %66 : vector<8x1xf32>
    %68 = vector.broadcast %60 : vector<8x1xf32> to vector<8x128xf32>
    %69 = arith.subf %54, %68 : vector<8x128xf32>
    %cst_28 = arith.constant 9.99999974E-6 : f32
    %70 = vector.broadcast %cst_28 : f32 to vector<8x1xf32>
    %71 = arith.addf %67, %70 : vector<8x1xf32>
    %72 = math.rsqrt %71 : vector<8x1xf32>
    %73 = vector.broadcast %72 : vector<8x1xf32> to vector<8x128xf32>
    %74 = arith.mulf %69, %73 : vector<8x128xf32>
    %75 = vector.broadcast %55 : vector<1x128xf32> to vector<8x128xf32>
    %76 = arith.mulf %74, %75 : vector<8x128xf32>
    %77 = vector.broadcast %56 : vector<1x128xf32> to vector<8x128xf32>
    %78 = arith.addf %76, %77 : vector<8x128xf32>
    %79 = vector.extract_strided_slice %5 {offsets = [5, 0], sizes = [1, 128], strides = [1, 1]} : vector<29x128xf32> to vector<1x128xf32>
    %80 = vector.extract_strided_slice %5 {offsets = [6, 0], sizes = [1, 128], strides = [1, 1]} : vector<29x128xf32> to vector<1x128xf32>
    %81 = vector.extract_strided_slice %5 {offsets = [7, 0], sizes = [1, 128], strides = [1, 1]} : vector<29x128xf32> to vector<1x128xf32>
    %82 = tpu.concatenate %79, %80, %81 in 1 : vector<1x128xf32>, vector<1x128xf32>, vector<1x128xf32> -> vector<1x384xf32>
    %c0_29 = arith.constant 0 : index
    %c0_30 = arith.constant 0 : index
    %c0_31 = arith.constant 0 : index
    %83 = vector.load %arg7[%c0_29, %c0_30, %c0_31] : memref<1x128x384xbf16, #tpu.memory_space<vmem>>, vector<1x128x384xbf16>
    %84 = vector.shape_cast %83 : vector<1x128x384xbf16> to vector<128x384xbf16>
    %85 = arith.truncf %78 : vector<8x128xf32> to vector<8x128xbf16>
    %cst_32 = arith.constant dense<0.000000e+00> : vector<8x384xf32>
    %86 = tpu.matmul %85, %84, %cst_32 {dimension_numbers = #tpu.dot_dimension_numbers<[1], [0], [0], [1], [0, 0, 1, 1], [], []>} : vector<8x128xbf16>, vector<128x384xbf16>, vector<8x384xf32> -> vector<8x384xf32>
    %87 = vector.broadcast %82 : vector<1x384xf32> to vector<8x384xf32>
    %88 = arith.addf %86, %87 : vector<8x384xf32>
    %89 = vector.extract_strided_slice %88 {offsets = [0, 0], sizes = [8, 32], strides = [1, 1]} : vector<8x384xf32> to vector<8x32xf32>
    %90 = vector.extract_strided_slice %88 {offsets = [0, 32], sizes = [8, 32], strides = [1, 1]} : vector<8x384xf32> to vector<8x32xf32>
    %91 = vector.extract_strided_slice %88 {offsets = [0, 64], sizes = [8, 32], strides = [1, 1]} : vector<8x384xf32> to vector<8x32xf32>
    %92 = vector.extract_strided_slice %88 {offsets = [0, 96], sizes = [8, 32], strides = [1, 1]} : vector<8x384xf32> to vector<8x32xf32>
    %93 = vector.shape_cast %89 : vector<8x32xf32> to vector<1x8x32xf32>
    %94 = vector.shape_cast %90 : vector<8x32xf32> to vector<1x8x32xf32>
    %95 = vector.shape_cast %91 : vector<8x32xf32> to vector<1x8x32xf32>
    %96 = vector.shape_cast %92 : vector<8x32xf32> to vector<1x8x32xf32>
    %97 = tpu.concatenate %93, %94, %95, %96 in 0 : vector<1x8x32xf32>, vector<1x8x32xf32>, vector<1x8x32xf32>, vector<1x8x32xf32> -> vector<4x8x32xf32>
    %98 = vector.extract_strided_slice %88 {offsets = [0, 128], sizes = [8, 32], strides = [1, 1]} : vector<8x384xf32> to vector<8x32xf32>
    %99 = vector.extract_strided_slice %88 {offsets = [0, 160], sizes = [8, 32], strides = [1, 1]} : vector<8x384xf32> to vector<8x32xf32>
    %100 = vector.extract_strided_slice %88 {offsets = [0, 192], sizes = [8, 32], strides = [1, 1]} : vector<8x384xf32> to vector<8x32xf32>
    %101 = vector.extract_strided_slice %88 {offsets = [0, 224], sizes = [8, 32], strides = [1, 1]} : vector<8x384xf32> to vector<8x32xf32>
    %102 = vector.shape_cast %98 : vector<8x32xf32> to vector<1x8x32xf32>
    %103 = vector.shape_cast %99 : vector<8x32xf32> to vector<1x8x32xf32>
    %104 = vector.shape_cast %100 : vector<8x32xf32> to vector<1x8x32xf32>
    %105 = vector.shape_cast %101 : vector<8x32xf32> to vector<1x8x32xf32>
    %106 = tpu.concatenate %102, %103, %104, %105 in 0 : vector<1x8x32xf32>, vector<1x8x32xf32>, vector<1x8x32xf32>, vector<1x8x32xf32> -> vector<4x8x32xf32>
    %107 = vector.extract_strided_slice %88 {offsets = [0, 256], sizes = [8, 32], strides = [1, 1]} : vector<8x384xf32> to vector<8x32xf32>
    %108 = vector.extract_strided_slice %88 {offsets = [0, 288], sizes = [8, 32], strides = [1, 1]} : vector<8x384xf32> to vector<8x32xf32>
    %109 = vector.extract_strided_slice %88 {offsets = [0, 320], sizes = [8, 32], strides = [1, 1]} : vector<8x384xf32> to vector<8x32xf32>
    %110 = vector.extract_strided_slice %88 {offsets = [0, 352], sizes = [8, 32], strides = [1, 1]} : vector<8x384xf32> to vector<8x32xf32>
    %111 = vector.shape_cast %107 : vector<8x32xf32> to vector<1x8x32xf32>
    %112 = vector.shape_cast %108 : vector<8x32xf32> to vector<1x8x32xf32>
    %113 = vector.shape_cast %109 : vector<8x32xf32> to vector<1x8x32xf32>
    %114 = vector.shape_cast %110 : vector<8x32xf32> to vector<1x8x32xf32>
    %115 = tpu.concatenate %111, %112, %113, %114 in 0 : vector<1x8x32xf32>, vector<1x8x32xf32>, vector<1x8x32xf32>, vector<1x8x32xf32> -> vector<4x8x32xf32>
    %116 = arith.truncf %97 : vector<4x8x32xf32> to vector<4x8x32xbf16>
    %117 = arith.truncf %106 : vector<4x8x32xf32> to vector<4x8x32xbf16>
    "tpu.trace_start"() <{level = 10 : i32, message = "hqe,hke->hqk"}> : () -> ()
    %cst_33 = arith.constant dense<0.000000e+00> : vector<4x8x8xf32>
    %118 = tpu.matmul %116, %117, %cst_33 {dimension_numbers = #tpu.dot_dimension_numbers<[2], [2], [1], [1], [0, 0, 0, 1, 1, 1], [0], [0]>} : vector<4x8x32xbf16>, vector<4x8x32xbf16>, vector<4x8x8xf32> -> vector<4x8x8xf32>
    "tpu.trace_stop"() : () -> ()
    %cst_34 = arith.constant dense<0xFF800000> : vector<4x8xf32>
    %119 = vector.multi_reduction <maximumf>, %118, %cst_34 [2] : vector<4x8x8xf32> to vector<4x8xf32>
    %120 = vector.shape_cast %119 : vector<4x8xf32> to vector<4x8x1xf32>
    %121 = vector.broadcast %120 : vector<4x8x1xf32> to vector<4x8x8xf32>
    %122 = arith.subf %118, %121 : vector<4x8x8xf32>
    %123 = math.exp %122 : vector<4x8x8xf32>
    %cst_35 = arith.constant dense<0.000000e+00> : vector<4x8xf32>
    %124 = vector.multi_reduction <add>, %123, %cst_35 [2] : vector<4x8x8xf32> to vector<4x8xf32>
    %125 = vector.shape_cast %124 : vector<4x8xf32> to vector<4x8x1xf32>
    %126 = tpu.reciprocal %125 {approx = true} : vector<4x8x1xf32> -> vector<4x8x1xf32>
    %127 = vector.broadcast %126 : vector<4x8x1xf32> to vector<4x8x8xf32>
    %128 = arith.mulf %123, %127 : vector<4x8x8xf32>
    %129 = arith.truncf %128 : vector<4x8x8xf32> to vector<4x8x8xbf16>
    %130 = arith.truncf %115 : vector<4x8x32xf32> to vector<4x8x32xbf16>
    "tpu.trace_start"() <{level = 10 : i32, message = "hqk,hke->hqe"}> : () -> ()
    %cst_36 = arith.constant dense<0.000000e+00> : vector<4x8x32xf32>
    %131 = tpu.matmul %129, %130, %cst_36 {dimension_numbers = #tpu.dot_dimension_numbers<[2], [1], [1], [2], [0, 0, 0, 1, 1, 2], [0], [0]>} : vector<4x8x8xbf16>, vector<4x8x32xbf16>, vector<4x8x32xf32> -> vector<4x8x32xf32>
    "tpu.trace_stop"() : () -> ()
    %132 = vector.extract_strided_slice %131 {offsets = [0, 0, 0], sizes = [1, 8, 32], strides = [1, 1, 1]} : vector<4x8x32xf32> to vector<1x8x32xf32>
    %133 = vector.shape_cast %132 : vector<1x8x32xf32> to vector<8x32xf32>
    %134 = vector.extract_strided_slice %131 {offsets = [1, 0, 0], sizes = [1, 8, 32], strides = [1, 1, 1]} : vector<4x8x32xf32> to vector<1x8x32xf32>
    %135 = vector.shape_cast %134 : vector<1x8x32xf32> to vector<8x32xf32>
    %136 = vector.extract_strided_slice %131 {offsets = [2, 0, 0], sizes = [1, 8, 32], strides = [1, 1, 1]} : vector<4x8x32xf32> to vector<1x8x32xf32>
    %137 = vector.shape_cast %136 : vector<1x8x32xf32> to vector<8x32xf32>
    %138 = vector.extract_strided_slice %131 {offsets = [3, 0, 0], sizes = [1, 8, 32], strides = [1, 1, 1]} : vector<4x8x32xf32> to vector<1x8x32xf32>
    %139 = vector.shape_cast %138 : vector<1x8x32xf32> to vector<8x32xf32>
    %140 = tpu.concatenate %133, %135, %137, %139 in 1 : vector<8x32xf32>, vector<8x32xf32>, vector<8x32xf32>, vector<8x32xf32> -> vector<8x128xf32>
    %c0_37 = arith.constant 0 : index
    %c0_38 = arith.constant 0 : index
    %c0_39 = arith.constant 0 : index
    %141 = vector.load %arg8[%c0_37, %c0_38, %c0_39] : memref<1x128x128xbf16, #tpu.memory_space<vmem>>, vector<1x128x128xbf16>
    %142 = vector.shape_cast %141 : vector<1x128x128xbf16> to vector<128x128xbf16>
    %143 = arith.truncf %140 : vector<8x128xf32> to vector<8x128xbf16>
    %cst_40 = arith.constant dense<0.000000e+00> : vector<8x128xf32>
    %144 = tpu.matmul %143, %142, %cst_40 {dimension_numbers = #tpu.dot_dimension_numbers<[1], [0], [0], [1], [0, 0, 1, 1], [], []>} : vector<8x128xbf16>, vector<128x128xbf16>, vector<8x128xf32> -> vector<8x128xf32>
    %145 = arith.addf %54, %144 : vector<8x128xf32>
    %146 = vector.extract_strided_slice %5 {offsets = [8, 0], sizes = [1, 128], strides = [1, 1]} : vector<29x128xf32> to vector<1x128xf32>
    %147 = vector.broadcast %146 : vector<1x128xf32> to vector<8x128xf32>
    %148 = arith.addf %145, %147 : vector<8x128xf32>
    %149 = vector.extract_strided_slice %5 {offsets = [9, 0], sizes = [1, 128], strides = [1, 1]} : vector<29x128xf32> to vector<1x128xf32>
    %150 = vector.extract_strided_slice %5 {offsets = [10, 0], sizes = [1, 128], strides = [1, 1]} : vector<29x128xf32> to vector<1x128xf32>
    %cst_41 = arith.constant dense<0.000000e+00> : vector<8xf32>
    %151 = vector.multi_reduction <add>, %148, %cst_41 [1] : vector<8x128xf32> to vector<8xf32>
    %152 = vector.shape_cast %151 : vector<8xf32> to vector<8x1xf32>
    %cst_42 = arith.constant 1.280000e+02 : f32
    %153 = vector.broadcast %cst_42 : f32 to vector<8x1xf32>
    %154 = arith.divf %152, %153 : vector<8x1xf32>
    %155 = vector.broadcast %154 : vector<8x1xf32> to vector<8x128xf32>
    %156 = arith.subf %148, %155 : vector<8x128xf32>
    %157 = arith.mulf %156, %156 : vector<8x128xf32>
    %cst_43 = arith.constant dense<0.000000e+00> : vector<8xf32>
    %158 = vector.multi_reduction <add>, %157, %cst_43 [1] : vector<8x128xf32> to vector<8xf32>
    %159 = vector.shape_cast %158 : vector<8xf32> to vector<8x1xf32>
    %cst_44 = arith.constant 1.280000e+02 : f32
    %160 = vector.broadcast %cst_44 : f32 to vector<8x1xf32>
    %161 = arith.divf %159, %160 : vector<8x1xf32>
    %162 = vector.broadcast %154 : vector<8x1xf32> to vector<8x128xf32>
    %163 = arith.subf %148, %162 : vector<8x128xf32>
    %cst_45 = arith.constant 9.99999974E-6 : f32
    %164 = vector.broadcast %cst_45 : f32 to vector<8x1xf32>
    %165 = arith.addf %161, %164 : vector<8x1xf32>
    %166 = math.rsqrt %165 : vector<8x1xf32>
    %167 = vector.broadcast %166 : vector<8x1xf32> to vector<8x128xf32>
    %168 = arith.mulf %163, %167 : vector<8x128xf32>
    %169 = vector.broadcast %149 : vector<1x128xf32> to vector<8x128xf32>
    %170 = arith.mulf %168, %169 : vector<8x128xf32>
    %171 = vector.broadcast %150 : vector<1x128xf32> to vector<8x128xf32>
    %172 = arith.addf %170, %171 : vector<8x128xf32>
    %c0_46 = arith.constant 0 : index
    %c0_47 = arith.constant 0 : index
    %c0_48 = arith.constant 0 : index
    %173 = vector.load %arg9[%c0_46, %c0_47, %c0_48] : memref<1x128x256xbf16, #tpu.memory_space<vmem>>, vector<1x128x256xbf16>
    %174 = vector.shape_cast %173 : vector<1x128x256xbf16> to vector<128x256xbf16>
    %175 = arith.truncf %172 : vector<8x128xf32> to vector<8x128xbf16>
    %cst_49 = arith.constant dense<0.000000e+00> : vector<8x256xf32>
    %176 = tpu.matmul %175, %174, %cst_49 {dimension_numbers = #tpu.dot_dimension_numbers<[1], [0], [0], [1], [0, 0, 1, 1], [], []>} : vector<8x128xbf16>, vector<128x256xbf16>, vector<8x256xf32> -> vector<8x256xf32>
    %177 = vector.extract_strided_slice %176 {offsets = [0, 0], sizes = [8, 128], strides = [1, 1]} : vector<8x256xf32> to vector<8x128xf32>
    %178 = vector.extract_strided_slice %5 {offsets = [11, 0], sizes = [1, 128], strides = [1, 1]} : vector<29x128xf32> to vector<1x128xf32>
    %179 = vector.broadcast %178 : vector<1x128xf32> to vector<8x128xf32>
    %180 = arith.addf %177, %179 : vector<8x128xf32>
    %181 = vector.extract_strided_slice %176 {offsets = [0, 128], sizes = [8, 128], strides = [1, 1]} : vector<8x256xf32> to vector<8x128xf32>
    %182 = vector.extract_strided_slice %5 {offsets = [12, 0], sizes = [1, 128], strides = [1, 1]} : vector<29x128xf32> to vector<1x128xf32>
    %183 = vector.broadcast %182 : vector<1x128xf32> to vector<8x128xf32>
    %184 = arith.addf %181, %183 : vector<8x128xf32>
    %185 = arith.negf %184 : vector<8x128xf32>
    %186 = math.exp %185 : vector<8x128xf32>
    %cst_50 = arith.constant 1.000000e+00 : f32
    %187 = vector.broadcast %cst_50 : f32 to vector<8x128xf32>
    %188 = arith.addf %187, %186 : vector<8x128xf32>
    %189 = arith.divf %187, %188 : vector<8x128xf32>
    %190 = arith.mulf %180, %189 : vector<8x128xf32>
    %191 = tpu.iota {dimensions = array<i32: 0>} : vector<8x1xi32>
    %c0_i32_51 = arith.constant 0 : i32
    %192 = vector.broadcast %c0_i32_51 : i32 to vector<8x1xi32>
    %193 = arith.cmpi eq, %191, %192 : vector<8x1xi32>
    %c1_i32 = arith.constant 1 : i32
    %194 = tpu.dynamic_rotate %190 by %c1_i32 dim 0 : vector<8x128xf32>, i32 -> vector<8x128xf32>
    %cst_52 = arith.constant 0.000000e+00 : f32
    %195 = vector.shape_cast %193 : vector<8x1xi1> to vector<8x1xi1>
    %196 = vector.broadcast %195 : vector<8x1xi1> to vector<8x128xi1>
    %197 = vector.broadcast %cst_52 : f32 to vector<8x128xf32>
    %198 = arith.select %196, %197, %194 : vector<8x128xi1>, vector<8x128xf32>
    %c7_i32 = arith.constant 7 : i32
    %199 = vector.broadcast %c7_i32 : i32 to vector<8x1xi32>
    %200 = arith.cmpi eq, %191, %199 : vector<8x1xi32>
    %c7_i32_53 = arith.constant 7 : i32
    %201 = tpu.dynamic_rotate %190 by %c7_i32_53 dim 0 : vector<8x128xf32>, i32 -> vector<8x128xf32>
    %cst_54 = arith.constant 0.000000e+00 : f32
    %202 = vector.shape_cast %200 : vector<8x1xi1> to vector<8x1xi1>
    %203 = vector.broadcast %202 : vector<8x1xi1> to vector<8x128xi1>
    %204 = vector.broadcast %cst_54 : f32 to vector<8x128xf32>
    %205 = arith.select %203, %204, %201 : vector<8x128xi1>, vector<8x128xf32>
    %206 = vector.extract_strided_slice %5 {offsets = [13, 0], sizes = [1, 128], strides = [1, 1]} : vector<29x128xf32> to vector<1x128xf32>
    %207 = vector.broadcast %206 : vector<1x128xf32> to vector<8x128xf32>
    %208 = arith.mulf %198, %207 : vector<8x128xf32>
    %209 = vector.extract_strided_slice %5 {offsets = [14, 0], sizes = [1, 128], strides = [1, 1]} : vector<29x128xf32> to vector<1x128xf32>
    %210 = vector.broadcast %209 : vector<1x128xf32> to vector<8x128xf32>
    %211 = arith.mulf %190, %210 : vector<8x128xf32>
    %212 = arith.addf %208, %211 : vector<8x128xf32>
    %213 = vector.extract_strided_slice %5 {offsets = [15, 0], sizes = [1, 128], strides = [1, 1]} : vector<29x128xf32> to vector<1x128xf32>
    %214 = vector.broadcast %213 : vector<1x128xf32> to vector<8x128xf32>
    %215 = arith.mulf %205, %214 : vector<8x128xf32>
    %216 = arith.addf %212, %215 : vector<8x128xf32>
    %217 = vector.extract_strided_slice %5 {offsets = [16, 0], sizes = [1, 128], strides = [1, 1]} : vector<29x128xf32> to vector<1x128xf32>
    %218 = vector.broadcast %217 : vector<1x128xf32> to vector<8x128xf32>
    %219 = arith.addf %216, %218 : vector<8x128xf32>
    %220 = vector.extract_strided_slice %5 {offsets = [19, 0], sizes = [1, 128], strides = [1, 1]} : vector<29x128xf32> to vector<1x128xf32>
    %221 = vector.broadcast %220 : vector<1x128xf32> to vector<8x128xf32>
    %222 = arith.subf %219, %221 : vector<8x128xf32>
    %223 = vector.extract_strided_slice %5 {offsets = [20, 0], sizes = [1, 128], strides = [1, 1]} : vector<29x128xf32> to vector<1x128xf32>
    %cst_55 = arith.constant 9.99999974E-6 : f32
    %224 = vector.broadcast %cst_55 : f32 to vector<1x128xf32>
    %225 = arith.addf %223, %224 : vector<1x128xf32>
    %226 = math.rsqrt %225 : vector<1x128xf32>
    %227 = vector.broadcast %226 : vector<1x128xf32> to vector<8x128xf32>
    %228 = arith.mulf %222, %227 : vector<8x128xf32>
    %229 = vector.extract_strided_slice %5 {offsets = [17, 0], sizes = [1, 128], strides = [1, 1]} : vector<29x128xf32> to vector<1x128xf32>
    %230 = vector.broadcast %229 : vector<1x128xf32> to vector<8x128xf32>
    %231 = arith.mulf %228, %230 : vector<8x128xf32>
    %232 = vector.extract_strided_slice %5 {offsets = [18, 0], sizes = [1, 128], strides = [1, 1]} : vector<29x128xf32> to vector<1x128xf32>
    %233 = vector.broadcast %232 : vector<1x128xf32> to vector<8x128xf32>
    %234 = arith.addf %231, %233 : vector<8x128xf32>
    %235 = arith.negf %234 : vector<8x128xf32>
    %236 = math.exp %235 : vector<8x128xf32>
    %cst_56 = arith.constant 1.000000e+00 : f32
    %237 = vector.broadcast %cst_56 : f32 to vector<8x128xf32>
    %238 = arith.addf %237, %236 : vector<8x128xf32>
    %239 = arith.divf %237, %238 : vector<8x128xf32>
    %240 = arith.mulf %234, %239 : vector<8x128xf32>
    %c0_57 = arith.constant 0 : index
    %c0_58 = arith.constant 0 : index
    %c0_59 = arith.constant 0 : index
    %241 = vector.load %arg10[%c0_57, %c0_58, %c0_59] : memref<1x128x128xbf16, #tpu.memory_space<vmem>>, vector<1x128x128xbf16>
    %242 = vector.shape_cast %241 : vector<1x128x128xbf16> to vector<128x128xbf16>
    %243 = arith.truncf %240 : vector<8x128xf32> to vector<8x128xbf16>
    %cst_60 = arith.constant dense<0.000000e+00> : vector<8x128xf32>
    %244 = tpu.matmul %243, %242, %cst_60 {dimension_numbers = #tpu.dot_dimension_numbers<[1], [0], [0], [1], [0, 0, 1, 1], [], []>} : vector<8x128xbf16>, vector<128x128xbf16>, vector<8x128xf32> -> vector<8x128xf32>
    %245 = arith.addf %148, %244 : vector<8x128xf32>
    %246 = vector.extract_strided_slice %5 {offsets = [21, 0], sizes = [1, 128], strides = [1, 1]} : vector<29x128xf32> to vector<1x128xf32>
    %247 = vector.broadcast %246 : vector<1x128xf32> to vector<8x128xf32>
    %248 = arith.addf %245, %247 : vector<8x128xf32>
    %249 = vector.extract_strided_slice %5 {offsets = [22, 0], sizes = [1, 128], strides = [1, 1]} : vector<29x128xf32> to vector<1x128xf32>
    %250 = vector.extract_strided_slice %5 {offsets = [23, 0], sizes = [1, 128], strides = [1, 1]} : vector<29x128xf32> to vector<1x128xf32>
    %cst_61 = arith.constant dense<0.000000e+00> : vector<8xf32>
    %251 = vector.multi_reduction <add>, %248, %cst_61 [1] : vector<8x128xf32> to vector<8xf32>
    %252 = vector.shape_cast %251 : vector<8xf32> to vector<8x1xf32>
    %cst_62 = arith.constant 1.280000e+02 : f32
    %253 = vector.broadcast %cst_62 : f32 to vector<8x1xf32>
    %254 = arith.divf %252, %253 : vector<8x1xf32>
    %255 = vector.broadcast %254 : vector<8x1xf32> to vector<8x128xf32>
    %256 = arith.subf %248, %255 : vector<8x128xf32>
    %257 = arith.mulf %256, %256 : vector<8x128xf32>
    %cst_63 = arith.constant dense<0.000000e+00> : vector<8xf32>
    %258 = vector.multi_reduction <add>, %257, %cst_63 [1] : vector<8x128xf32> to vector<8xf32>
    %259 = vector.shape_cast %258 : vector<8xf32> to vector<8x1xf32>
    %cst_64 = arith.constant 1.280000e+02 : f32
    %260 = vector.broadcast %cst_64 : f32 to vector<8x1xf32>
    %261 = arith.divf %259, %260 : vector<8x1xf32>
    %262 = vector.broadcast %254 : vector<8x1xf32> to vector<8x128xf32>
    %263 = arith.subf %248, %262 : vector<8x128xf32>
    %cst_65 = arith.constant 9.99999974E-6 : f32
    %264 = vector.broadcast %cst_65 : f32 to vector<8x1xf32>
    %265 = arith.addf %261, %264 : vector<8x1xf32>
    %266 = math.rsqrt %265 : vector<8x1xf32>
    %267 = vector.broadcast %266 : vector<8x1xf32> to vector<8x128xf32>
    %268 = arith.mulf %263, %267 : vector<8x128xf32>
    %269 = vector.broadcast %249 : vector<1x128xf32> to vector<8x128xf32>
    %270 = arith.mulf %268, %269 : vector<8x128xf32>
    %271 = vector.broadcast %250 : vector<1x128xf32> to vector<8x128xf32>
    %272 = arith.addf %270, %271 : vector<8x128xf32>
    %c0_66 = arith.constant 0 : index
    %c1 = arith.constant 1 : index
    %c0_67 = arith.constant 0 : index
    %c0_68 = arith.constant 0 : index
    %273 = vector.load %arg5[%c0_66, %c1, %c0_67, %c0_68] : memref<1x2x128x256xbf16, #tpu.memory_space<vmem>>, vector<1x1x128x256xbf16>
    %274 = vector.shape_cast %273 : vector<1x1x128x256xbf16> to vector<128x256xbf16>
    %275 = arith.truncf %272 : vector<8x128xf32> to vector<8x128xbf16>
    %cst_69 = arith.constant dense<0.000000e+00> : vector<8x256xf32>
    %276 = tpu.matmul %275, %274, %cst_69 {dimension_numbers = #tpu.dot_dimension_numbers<[1], [0], [0], [1], [0, 0, 1, 1], [], []>} : vector<8x128xbf16>, vector<128x256xbf16>, vector<8x256xf32> -> vector<8x256xf32>
    %277 = vector.extract_strided_slice %7 {offsets = [1, 0], sizes = [1, 256], strides = [1, 1]} : vector<2x256xf32> to vector<1x256xf32>
    %278 = vector.broadcast %277 : vector<1x256xf32> to vector<8x256xf32>
    %279 = arith.addf %276, %278 : vector<8x256xf32>
    %280 = arith.negf %279 : vector<8x256xf32>
    %281 = math.exp %280 : vector<8x256xf32>
    %cst_70 = arith.constant 1.000000e+00 : f32
    %282 = vector.broadcast %cst_70 : f32 to vector<8x256xf32>
    %283 = arith.addf %282, %281 : vector<8x256xf32>
    %284 = arith.divf %282, %283 : vector<8x256xf32>
    %285 = arith.mulf %279, %284 : vector<8x256xf32>
    %c0_71 = arith.constant 0 : index
    %c1_72 = arith.constant 1 : index
    %c0_73 = arith.constant 0 : index
    %c0_74 = arith.constant 0 : index
    %286 = vector.load %arg6[%c0_71, %c1_72, %c0_73, %c0_74] : memref<1x2x256x128xbf16, #tpu.memory_space<vmem>>, vector<1x1x256x128xbf16>
    %287 = vector.shape_cast %286 : vector<1x1x256x128xbf16> to vector<256x128xbf16>
    %288 = arith.truncf %285 : vector<8x256xf32> to vector<8x256xbf16>
    %cst_75 = arith.constant dense<0.000000e+00> : vector<8x128xf32>
    %289 = tpu.matmul %288, %287, %cst_75 {dimension_numbers = #tpu.dot_dimension_numbers<[1], [0], [0], [1], [0, 0, 1, 1], [], []>} : vector<8x256xbf16>, vector<256x128xbf16>, vector<8x128xf32> -> vector<8x128xf32>
    %290 = vector.extract_strided_slice %5 {offsets = [24, 0], sizes = [1, 128], strides = [1, 1]} : vector<29x128xf32> to vector<1x128xf32>
    %291 = vector.broadcast %290 : vector<1x128xf32> to vector<8x128xf32>
    %292 = arith.addf %289, %291 : vector<8x128xf32>
    %cst_76 = arith.constant 5.000000e-01 : f32
    %293 = vector.broadcast %cst_76 : f32 to vector<8x128xf32>
    %294 = arith.mulf %293, %292 : vector<8x128xf32>
    %295 = arith.addf %248, %294 : vector<8x128xf32>
    %296 = vector.extract_strided_slice %5 {offsets = [25, 0], sizes = [1, 128], strides = [1, 1]} : vector<29x128xf32> to vector<1x128xf32>
    %297 = vector.extract_strided_slice %5 {offsets = [26, 0], sizes = [1, 128], strides = [1, 1]} : vector<29x128xf32> to vector<1x128xf32>
    %cst_77 = arith.constant dense<0.000000e+00> : vector<8xf32>
    %298 = vector.multi_reduction <add>, %295, %cst_77 [1] : vector<8x128xf32> to vector<8xf32>
    %299 = vector.shape_cast %298 : vector<8xf32> to vector<8x1xf32>
    %cst_78 = arith.constant 1.280000e+02 : f32
    %300 = vector.broadcast %cst_78 : f32 to vector<8x1xf32>
    %301 = arith.divf %299, %300 : vector<8x1xf32>
    %302 = vector.broadcast %301 : vector<8x1xf32> to vector<8x128xf32>
    %303 = arith.subf %295, %302 : vector<8x128xf32>
    %304 = arith.mulf %303, %303 : vector<8x128xf32>
    %cst_79 = arith.constant dense<0.000000e+00> : vector<8xf32>
    %305 = vector.multi_reduction <add>, %304, %cst_79 [1] : vector<8x128xf32> to vector<8xf32>
    %306 = vector.shape_cast %305 : vector<8xf32> to vector<8x1xf32>
    %cst_80 = arith.constant 1.280000e+02 : f32
    %307 = vector.broadcast %cst_80 : f32 to vector<8x1xf32>
    %308 = arith.divf %306, %307 : vector<8x1xf32>
    %309 = vector.broadcast %301 : vector<8x1xf32> to vector<8x128xf32>
    %310 = arith.subf %295, %309 : vector<8x128xf32>
    %cst_81 = arith.constant 9.99999974E-6 : f32
    %311 = vector.broadcast %cst_81 : f32 to vector<8x1xf32>
    %312 = arith.addf %308, %311 : vector<8x1xf32>
    %313 = math.rsqrt %312 : vector<8x1xf32>
    %314 = vector.broadcast %313 : vector<8x1xf32> to vector<8x128xf32>
    %315 = arith.mulf %310, %314 : vector<8x128xf32>
    %316 = vector.broadcast %296 : vector<1x128xf32> to vector<8x128xf32>
    %317 = arith.mulf %315, %316 : vector<8x128xf32>
    %318 = vector.broadcast %297 : vector<1x128xf32> to vector<8x128xf32>
    %319 = arith.addf %317, %318 : vector<8x128xf32>
    %c0_82 = arith.constant 0 : index
    %c0_83 = arith.constant 0 : index
    %320 = vector.load %arg12[%c0_82, %c0_83] : memref<8x128xf32, #tpu.memory_space<vmem>>, vector<8x128xf32>
    tpu.vector_store %arg12[%c0_82, %c0_83], %319 {strides = array<i32>} : memref<8x128xf32, #tpu.memory_space<vmem>>, vector<8x128xf32>,
    %c1_i32_84 = arith.constant 1 : i32
    %321 = arith.cmpi eq, %arg1, %c1_i32_84 : i32
    %322 = arith.extui %321 : i1 to i32
    %c0_i32_85 = arith.constant 0 : i32
    %323 = arith.cmpi ne, %322, %c0_i32_85 : i32
    scf.if %323 {
      %324 = vector.extract_strided_slice %5 {offsets = [27, 0], sizes = [1, 128], strides = [1, 1]} : vector<29x128xf32> to vector<1x128xf32>
      %325 = vector.extract_strided_slice %5 {offsets = [28, 0], sizes = [1, 128], strides = [1, 1]} : vector<29x128xf32> to vector<1x128xf32>
      %cst_86 = arith.constant dense<0.000000e+00> : vector<8xf32>
      %326 = vector.multi_reduction <add>, %319, %cst_86 [1] : vector<8x128xf32> to vector<8xf32>
      %327 = vector.shape_cast %326 : vector<8xf32> to vector<8x1xf32>
      %cst_87 = arith.constant 1.280000e+02 : f32
      %328 = vector.broadcast %cst_87 : f32 to vector<8x1xf32>
      %329 = arith.divf %327, %328 : vector<8x1xf32>
      %330 = vector.broadcast %329 : vector<8x1xf32> to vector<8x128xf32>
      %331 = arith.subf %319, %330 : vector<8x128xf32>
      %332 = arith.mulf %331, %331 : vector<8x128xf32>
      %cst_88 = arith.constant dense<0.000000e+00> : vector<8xf32>
      %333 = vector.multi_reduction <add>, %332, %cst_88 [1] : vector<8x128xf32> to vector<8xf32>
      %334 = vector.shape_cast %333 : vector<8xf32> to vector<8x1xf32>
      %cst_89 = arith.constant 1.280000e+02 : f32
      %335 = vector.broadcast %cst_89 : f32 to vector<8x1xf32>
      %336 = arith.divf %334, %335 : vector<8x1xf32>
      %337 = vector.broadcast %329 : vector<8x1xf32> to vector<8x128xf32>
      %338 = arith.subf %319, %337 : vector<8x128xf32>
      %cst_90 = arith.constant 9.99999974E-6 : f32
      %339 = vector.broadcast %cst_90 : f32 to vector<8x1xf32>
      %340 = arith.addf %336, %339 : vector<8x1xf32>
      %341 = math.rsqrt %340 : vector<8x1xf32>
      %342 = vector.broadcast %341 : vector<8x1xf32> to vector<8x128xf32>
      %343 = arith.mulf %338, %342 : vector<8x128xf32>
      %344 = vector.broadcast %324 : vector<1x128xf32> to vector<8x128xf32>
      %345 = arith.mulf %343, %344 : vector<8x128xf32>
      %346 = vector.broadcast %325 : vector<1x128xf32> to vector<8x128xf32>
      %347 = arith.addf %345, %346 : vector<8x128xf32>
      %c0_91 = arith.constant 0 : index
      %c0_92 = arith.constant 0 : index
      %c0_93 = arith.constant 0 : index
      %348 = vector.load %arg11[%c0_91, %c0_92, %c0_93] : memref<1x8x128xf32, #tpu.memory_space<vmem>>, vector<1x8x128xf32>
      %349 = vector.shape_cast %348 : vector<1x8x128xf32> to vector<8x128xf32>
      %350 = vector.shape_cast %347 : vector<8x128xf32> to vector<1x8x128xf32>
      tpu.vector_store %arg11[%c0_91, %c0_92, %c0_93], %350 {strides = array<i32>} : memref<1x8x128xf32, #tpu.memory_space<vmem>>, vector<1x8x128xf32>,
    } else {
    }
    return
  }
  func.func @transform_0(%arg0: i32, %arg1: i32) -> (i32, i32, i32) {
    %c0_i32 = arith.constant 0 : i32
    %c0_i32_0 = arith.constant 0 : i32
    %c0_i32_1 = arith.constant 0 : i32
    return %arg0, %c0_i32, %c0_i32_0 : i32, i32, i32
  }
  func.func @transform_1(%arg0: i32, %arg1: i32) -> (i32, i32, i32) {
    %c0_i32 = arith.constant 0 : i32
    %c0_i32_0 = arith.constant 0 : i32
    %c0_i32_1 = arith.constant 0 : i32
    return %arg1, %c0_i32, %c0_i32_0 : i32, i32, i32
  }
  func.func @transform_2(%arg0: i32, %arg1: i32) -> (i32, i32, i32) {
    %c0_i32 = arith.constant 0 : i32
    %c0_i32_0 = arith.constant 0 : i32
    %c0_i32_1 = arith.constant 0 : i32
    return %arg1, %c0_i32, %c0_i32_0 : i32, i32, i32
  }
  func.func @transform_3(%arg0: i32, %arg1: i32) -> (i32, i32, i32, i32) {
    %c0_i32 = arith.constant 0 : i32
    %c0_i32_0 = arith.constant 0 : i32
    %c0_i32_1 = arith.constant 0 : i32
    %c0_i32_2 = arith.constant 0 : i32
    return %arg1, %c0_i32, %c0_i32_0, %c0_i32_1 : i32, i32, i32, i32
  }
  func.func @transform_4(%arg0: i32, %arg1: i32) -> (i32, i32, i32, i32) {
    %c0_i32 = arith.constant 0 : i32
    %c0_i32_0 = arith.constant 0 : i32
    %c0_i32_1 = arith.constant 0 : i32
    %c0_i32_2 = arith.constant 0 : i32
    return %arg1, %c0_i32, %c0_i32_0, %c0_i32_1 : i32, i32, i32, i32
  }
  func.func @transform_5(%arg0: i32, %arg1: i32) -> (i32, i32, i32) {
    %c0_i32 = arith.constant 0 : i32
    %c0_i32_0 = arith.constant 0 : i32
    %c0_i32_1 = arith.constant 0 : i32
    return %arg1, %c0_i32, %c0_i32_0 : i32, i32, i32
  }
  func.func @transform_6(%arg0: i32, %arg1: i32) -> (i32, i32, i32) {
    %c0_i32 = arith.constant 0 : i32
    %c0_i32_0 = arith.constant 0 : i32
    %c0_i32_1 = arith.constant 0 : i32
    return %arg1, %c0_i32, %c0_i32_0 : i32, i32, i32
  }
  func.func @transform_7(%arg0: i32, %arg1: i32) -> (i32, i32, i32) {
    %c0_i32 = arith.constant 0 : i32
    %c0_i32_0 = arith.constant 0 : i32
    %c0_i32_1 = arith.constant 0 : i32
    return %arg1, %c0_i32, %c0_i32_0 : i32, i32, i32
  }
  func.func @transform_8(%arg0: i32, %arg1: i32) -> (i32, i32, i32) {
    %c0_i32 = arith.constant 0 : i32
    %c0_i32_0 = arith.constant 0 : i32
    %c0_i32_1 = arith.constant 0 : i32
    return %arg1, %c0_i32, %c0_i32_0 : i32, i32, i32
  }
  func.func @transform_9(%arg0: i32, %arg1: i32) -> (i32, i32, i32) {
    %c0_i32 = arith.constant 0 : i32
    %c0_i32_0 = arith.constant 0 : i32
    %c0_i32_1 = arith.constant 0 : i32
    return %arg0, %c0_i32, %c0_i32_0 : i32, i32, i32
  }
}

</mosaic_0001>

<bundles_post_ra>
// kernel: conformer_encoder_forward.2
= control target key start
LH: loop header
LB: loop body
LE: loop exit
PB: predicated region body
PF: predicated region fallthrough
CT: control target
= control target key end

     0   :  { %8 = vsyncpa [#allocation3], 0  ;;  %s138_s12 = smov [#allocation2]   ;;  %s178_s0 = inlined_call_operand.hbm [shape: f32[16,16], index: 0, kind: input, shape index: {}]   ;;  %s179_s1 = inlined_call_operand.vmem [shape: bf16[16,128], index: 1, kind: input, shape index: {}]   ;;  %s180_s2 = inlined_call_operand.vmem [shape: f32[1,128], index: 2, kind: input, shape index: {}]   ;;  %s181_s3 = inlined_call_operand.vmem [shape: f32[16,128], index: 3, kind: output, shape index: {}]  }
   0x1   :  { %s14_s13 = sshll.u32 %s138_s12, 4  ;;  %s15_s13 = int_to_ptr.vmem [resolvable:$true] %s14_s13 }
   0x2   :  { %s124_s14 = scalar_lea.vmem %s15_s13, 256  ;;  %p129_p1 = scmp.lt.s32.totalorder %s15_s13, %s15_s13 }
   0x3   :  { %p125_p0 = scmp.ne.s32.totalorder %s15_s13, %s124_s14  ;;  %p130_p2 = scmp.lt.s32.totalorder %s124_s14, %s124_s14 }
   0x5   :  { %p131_p3 = por %p130_p2, %p129_p1 }
   0x7   :  { %p132_p4 = pnand %p131_p3, %p125_p0 }
   0x9   :  { %135 = shalt.err (!%p132_p4)
}
   0xa   :  { %s139_s15 = smov 128   ;;  %s140_s16 = smov 8  }
   0xb   :  { %20 = dma.hbm_to_vmem [thread:$0]  %s178_s0, 256, %s15_s13, [#allocation3], %s139_s15, %s139_s15, %s140_s16  }
   0xc   :  { %136 = dma.done.wait [#allocation3], 256  }
   0xd   :  { %137 = vsyncadd [#allocation3], 4294967040  ;;  %v141_v0 = vmov 0.0   ;;  %vm142_vm0 = vmmov 0   ;;  %v115_v1 = vld [vmem:[%s179_s1] sm:$0xff]   ;;  %v30_v3 = vld [vmem:[#allocation2 + $0x8] sm:$0xff] }
   0xe   :  { %104 = vmatprep.subr.bf16.mxu0 %v141_v0  ;;  %106 = vmatprep.mubr.msk.bf16.mxu0 %vm142_vm0, %v141_v0  ;;  %v29_v2 = vld [vmem:[#allocation2] sm:$0xff]  ;;  %vm47_vm1 = vcmask 130048  }
   0xf   :  { %105 = vmatpush3.bf16.msra.mxu0 %v115_v1  ;;  %v33_v4 = vpack.c.bf16 %v30_v3, %v29_v2  ;;  %v99_v5 = vld [vmem:[%s180_s2] ss:$0 sm:$0xff] }
  0x12   :  { %107 = vmatmul.mubr.msk.bf16.vlgmr.msra.gmra.mxu0 %vm47_vm1, %v33_v4 }
  0xd2   :  { %v85_v6 = vpop.f32.mrf.mxu0 }
  0xd3   :  { %v86_v7 = vadd.f32 %v99_v5, %v85_v6 }
  0xd4   :  { %v108_v8 = vpop.f32.mrf.mxu0 }
  0xd5   :  { %92 = vst [vmem:[%s181_s3] sm:$0xff] %v86_v7 }
  0xd6   :  { %v88_v9 = vpop.f32.mrf.mxu0 }
  0xd7   :  { %v89_v10 = vadd.f32 %v99_v5, %v88_v9 }
  0xd8   :  { %v109_v11 = vpop.f32.mrf.mxu0 }
  0xd9   :  { %93 = vst [vmem:[%s181_s3 + $0x8] sm:$0xff] %v89_v10 }
  0xda   :  { %98 = vsyncpa [#allocation3], 1 }

// kernel: conformer_encoder_forward.3
= control target key start
LH: loop header
LB: loop body
LE: loop exit
PB: predicated region body
PF: predicated region fallthrough
CT: control target
= control target key end

     0   :  { %s4605_s0 = inlined_call_operand.vmem [shape: f32[2,8,128], index: 0, kind: input, shape index: {}]   ;;  %s4606_s1 = inlined_call_operand.vmem [shape: f32[2,29,128], index: 1, kind: input, shape index: {}]   ;;  %s4607_s2 = inlined_call_operand.vmem [shape: f32[2,2,256], index: 2, kind: input, shape index: {}]   ;;  %s4608_s3 = inlined_call_operand.hbm [shape: bf16[2,2,128,256], index: 3, kind: input, shape index: {}]   ;;  %s4609_s4 = inlined_call_operand.hbm [shape: bf16[2,2,256,128], index: 4, kind: input, shape index: {}]   ;;  %s4610_s5 = inlined_call_operand.hbm [shape: bf16[2,128,384], index: 5, kind: input, shape index: {}]   ;;  %s4611_s6 = inlined_call_operand.vmem [shape: bf16[2,128,128], index: 6, kind: input, shape index: {}]   ;;  %s4612_s7 = inlined_call_operand.hbm [shape: bf16[2,128,256], index: 7, kind: input, shape index: {}]   ;;  %s4613_s8 = inlined_call_operand.hbm [shape: bf16[2,128,128], index: 8, kind: input, shape index: {}]   ;;  %s4614_s9 = inlined_call_operand.hbm [shape: f32[2,8,128], index: 9, kind: output, shape index: {}]  }
   0x1   :  { %4635 = sst [smem:[#allocation30_spill]] %s4605_s0 }
   0x2   :  { %4636 = sst [smem:[#allocation31_spill]] %s4606_s1 }
   0x3   :  { %4637 = sst [smem:[#allocation32_spill]] %s4607_s2 }
   0x4   :  { %4638 = sst [smem:[#allocation33_spill]] %s4608_s3 }
   0x5   :  { %4639 = sst [smem:[#allocation34_spill]] %s4609_s4 }
   0x6   :  { %4640 = sst [smem:[#allocation35_spill]] %s4610_s5 }
   0x7   :  { %4641 = sst [smem:[#allocation36_spill]] %s4611_s6 }
   0x8   :  { %4642 = sst [smem:[#allocation37_spill]] %s4612_s7 }
   0x9   :  { %4643 = sst [smem:[#allocation38_spill]] %s4613_s8 }
   0xa   :  { %4644 = sst [smem:[#allocation39_spill]] %s4614_s9 }
   0xb   :  { %14 = vsyncpa [#allocation4], 0 }
   0xc   :  { %16 = vsyncpa [#allocation4 + $0x1], 0 }
   0xd   :  { %17 = vsyncpa [#allocation7], 0 }
   0xe   :  { %19 = vsyncpa [#allocation7 + $0x1], 0 }
   0xf   :  { %20 = vsyncpa [#allocation10], 0 }
  0x10   :  { %22 = vsyncpa [#allocation10 + $0x1], 0 }
  0x11   :  { %23 = vsyncpa [#allocation5], 0 }
  0x12   :  { %25 = vsyncpa [#allocation5 + $0x1], 0  ;;  %s3943_s30 = smov 0   ;;  %s3945_s10 = smov 0  }
  0x13   :  { %s3947_s11 = smov 0   ;;  %s3949_s12 = smov 0  }
  0x14   :  { %s3951_s13 = smov 0   ;;  %s3953_s14 = smov 0  }
  0x15   :  { %s3955_s15 = smov 0   ;;  %s3957_s16 = smov 0  }
  0x16   :  { %s3959_s17 = smov 0   ;;  %s3961_s18 = smov 0  }
  0x17   :  { %s3963_s19 = smov 0  }
  0x18 LB: > { %4645 = sst [smem:[#allocation17_spill]] %s3833_s30  ;;  %s3997_s20 = sadd.s32 4294967295, %s3873_s19   ;;  %s3873_s19 = sphi %s3963_s19, %s31_s19   ;;  %s3869_s18 = sphi %s3961_s18, %s4703_s18   ;;  %s3865_s17 = sphi %s3959_s17, %s4702_s17   ;;  %s3861_s16 = sphi %s3957_s16, %s4694_s16   ;;  %s3857_s15 = sphi %s3955_s15, %s4701_s15   ;;  %s3853_s14 = sphi %s3953_s14, %s4693_s14   ;;  %s3849_s13 = sphi %s3951_s13, %s4700_s13   ;;  %s3845_s12 = sphi %s3949_s12, %s4699_s12   ;;  %s3841_s11 = sphi %s3947_s11, %s4691_s11   ;;  %s3837_s10 = sphi %s3945_s10, %s4698_s10   ;;  %s3833_s30 = sphi %s3943_s30, %s4697_s30  }
  0x19   : > { %4646 = sst [smem:[#allocation18_spill]] %s3841_s11  ;;  %s2842_s21 = sadd.s32 4294967294, %s3873_s19  }
  0x1a   : > { %4647 = sst [smem:[#allocation19_spill]] %s3853_s14  ;;  %s40_s22 = sadd.s32 1, %s3865_s17 }
  0x1b   : > { %4648 = sst [smem:[#allocation20_spill]] %s3857_s15  ;;  %s43_s23 = sadd.s32 1, %s3869_s18 }
  0x1c   : > { %4649 = sst [smem:[#allocation21_spill]] %s3861_s16  ;;  %p41_p0 = scmp.ge.s32.totalorder %s40_s22, 2 }
  0x1d   : > { %4650 = sst [smem:[#allocation22_spill]] %s3869_s18  ;;  %s128_s24 = sadd.s32 1, %s3853_s14 }
  0x1e   : > { %4651 = sst [smem:[#allocation23_spill]] %s3873_s19  ;;  %p135_p1 = scmp.ne.s32.totalorder %s3853_s14, %s3849_s13 }
  0x1f   : > { %p136_p2 = scmp.eq.s32.totalorder %s3873_s19, 0  ;;  %s4705_s22 = smov (%p41_p0, %s40_s22), 0 }
  0x20   : > { %4652 = sst [smem:[#allocation24_spill]] %s4705_s22  ;;  %s4707_s23 = smov (!%p41_p0, %s43_s23), %s3869_s18 }
  0x21   : > { %s125_s25 = ssub.s32 %s3865_s17, %s4705_s22  ;;  %p4011_p3 = por %p136_p2, %p135_p1 }
  0x22   : > { %p45_p4 = scmp.ge.s32.totalorder %s4707_s23, 2  ;;  %p126_p5 = scmp.eq.s32.totalorder %s125_s25, 0 }
  0x23   : > { %p141_p6 = scmp.ne.s32.totalorder %s3849_s13, %s3845_s12  ;;  %p142_p7 = scmp.eq.s32.totalorder %s3997_s20, 0 }
  0x24   : > { %s4709_s23 = smov (%p45_p4, %s4707_s23), 0  ;;  %s284_s22 = sadd.s32 1, %s3841_s11 }
  0x25   : > { %4654 = sst [smem:[#allocation25_spill]] %s4709_s23  ;;  %p4022_p8 = por %p142_p7, %p141_p6 }
  0x26   : > { %s4020_s27 = scalar_select %p126_p5, %s3853_s14, %s128_s24  }
  0x27   : > { %s281_s29 = ssub.s32 %s3869_s18, %s4709_s23  ;;  %p294_p10 = scmp.ne.s32.totalorder %s3841_s11, %s3837_s10 }
  0x28   : > { %4655 = sst [smem:[#allocation26_spill]] %s4020_s27  ;;  %p282_p9 = scmp.eq.s32.totalorder %s281_s29, 0 }
  0x29   : > { %p295_p11 = scmp.eq.s32.totalorder %s3997_s20, 3  ;;  %p300_p13 = scmp.ne.s32.totalorder %s3837_s10, %s3833_s30 }
  0x2a   : > { %s4033_s12 = scalar_select %p282_p9, %s3841_s11, %s284_s22  }
  0x2b   : > { %p4035_p12 = por %p295_p11, %p294_p10  ;;  %p301_p0 = scmp.eq.s32.totalorder %s2842_s21, 3 }
  0x2c   : > { %4657 = sst [smem:[#allocation27_spill]] %s4033_s12  ;;  %p3296_p1 = scmp.lt.s32.totalorder %s3873_s19, 4 }
  0x2d   : > { %s4658_s25 = scalar_select %p4035_p12, 1, 0 }
  0x2e   : > { %s4043_s24 = sand.u32 1, %s3853_s14   ;;  %p4045_p2 = por %p301_p0, %p300_p13 }
  0x2f   : > { %4659 = sst [smem:[#allocation28_spill]] %s4658_s25  ;;  %s4623_s23 = sshll.u32 %s4043_s24, 8 }
  0x30   : > { %s4660_s29 = scalar_select %p4045_p2, 1, 0 }
  0x31   : > { %s4624_s18 = sshll.u32 %s3865_s17, 12  ;;  %p4053_p4 = pnand %p3296_p1, %p4011_p3 }
  0x32   : > { %4661 = sst [smem:[#allocation29_spill]] %s4660_s29  ;;  %s4625_s27 = sand.u32 1, %s3873_s19  }
  0x33   : > { %s4663_s4 = sld [smem:[#allocation34_spill]]  ;;  %s369_s11 = scalar_lea.vmem [#allocation6], %s4623_s23 }
  0x34   : > { %s376_s30 = sshll.u32 %s369_s11, 4  ;;  %p2858_p5 = scmp.ge.s32.totalorder %s3873_s19, 1  ;;  %s377_s30 = int_to_ptr.vmem [resolvable:$true] %s376_s30 }
  0x35   : > { %s4068_s29 = scalar_lea.sflag [#allocation7], %s4625_s27  ;;  %p4072_p3 = pneg %p4053_p4 }
  0x36   : > { %s3618_s9 = scalar_lea.vmem %s377_s30, 4096  ;;  %s3875_s12 = smov [#allocation6]  }
  0x37   : > { %p3619_p6 = scmp.ne.s32.totalorder %s377_s30, %s3618_s9  ;;  %s3623_s21 = sshll.u32 %s3875_s12, 4  ;;  %s3624_s21 = int_to_ptr.vmem [resolvable:$false] %s3623_s21 }
  0x38   : > { %s3625_s11 = scalar_lea.vmem %s3624_s21, 8192  ;;  %p3626_p10 = scmp.lt.s32.totalorder %s377_s30, %s3624_s21 }
  0x39   : > { %s375_s14 = scalar_lea.hbm %s4663_s4, %s4624_s18  ;;  %p3621_p7 = pnand %p3619_p6, %p4072_p3 }
  0x3a   : > { %p3627_p11 = scmp.lt.s32.totalorder %s3625_s11, %s3618_s9 }
  0x3b   : > { %p3622_p9 = pneg %p3621_p7 }
  0x3c   : > { %p3628_p13 = por %p3627_p11, %p3626_p10 }
  0x3e   : > { %p3629_p0 = pnand %p3628_p13, %p3622_p9 }
  0x40   : > { %3632 = shalt.err (!%p3629_p0)
}
  0x41   : > { %s4628_s23 = smov 64   ;;  %s4629_s18 = smov 4  }
  0x42   : > { %3282 = dma.hbm_to_vmem [thread:$0]  (!%p4053_p4), %s375_s14, 4096, %s377_s30, %s4068_s29, %s4628_s23, %s4628_s23, %s4629_s18  }
  0x43   : > { %p455_p1 = scmp.lt.s32.totalorder %s3873_s19, 5  ;;  %s2852_s12 = sshll.u32 %s4043_s24, 7 }
  0x44   : > { %s3061_s21 = sshll.u32 %s3865_s17, 11  ;;  %s4666_s7 = sld [smem:[#allocation37_spill]] }
  0x45   : > { %p4087_p6 = pnand %p2858_p5, %p455_p1  ;;  %s419_s25 = scalar_lea.vmem [#allocation9], %s2852_s12 }
  0x46   : > { %s426_s6 = sshll.u32 %s419_s25, 4  ;;  %s4667_s2 = sand.u32 1, %s3873_s19   ;;  %s427_s6 = int_to_ptr.vmem [resolvable:$true] %s426_s6 }
  0x47   : > { %s4098_s1 = scalar_lea.sflag [#allocation10], %s4667_s2  ;;  %s3646_s0 = scalar_lea.vmem %s427_s6, 2048 }
  0x48   : > { %p3647_p7 = scmp.ne.s32.totalorder %s427_s6, %s3646_s0  ;;  %s3878_s30 = smov [#allocation9]  }
  0x49   : > { %s3651_s14 = sshll.u32 %s3878_s30, 4  ;;  %s3652_s14 = int_to_ptr.vmem [resolvable:$false] %s3651_s14 }
  0x4a   : > { %s425_s4 = scalar_lea.hbm %s4666_s7, %s3061_s21  ;;  %p3649_p9 = pnand %p3647_p7, %p4072_p3 }
  0x4b   : > { %s3653_s23 = scalar_lea.vmem %s3652_s14, 4096  ;;  %p3654_p10 = scmp.lt.s32.totalorder %s427_s6, %s3652_s14 }
  0x4c   : > { %p3650_p5 = pneg %p3649_p9  ;;  %p3655_p11 = scmp.lt.s32.totalorder %s3653_s23, %s3646_s0 }
  0x4e   : > { %p3656_p13 = por %p3655_p11, %p3654_p10 }
  0x50   : > { %p3657_p0 = pnand %p3656_p13, %p3650_p5 }
  0x52   : > { %3660 = shalt.err (!%p3657_p0)
}
  0x53   : > { %s3879_s27 = smov 128   ;;  %s3880_s2 = smov 8  }
  0x54   : > { %3288 = dma.hbm_to_vmem [thread:$0]  (!%p4053_p4), %s425_s4, 2048, %s427_s6, %s4098_s1, %s3879_s27, %s3879_s27, %s3880_s2  }
  0x55   : > { %s4668_s25 = sshll.u32 %s3865_s17, 12  ;;  %s4669_s3 = sld [smem:[#allocation33_spill]] }
  0x56   : > { %s4670_s23 = sshll.u32 %s4043_s24, 8  ;;  %s3261_s14 = smul.u32 192, %s4043_s24 }
  0x57   : > { %s348_s11 = scalar_lea.vmem [#allocation3], %s4670_s23  ;;  %s3262_s18 = smul.u32 3072, %s3865_s17 }
  0x58   : > { %s355_s30 = sshll.u32 %s348_s11, 4  ;;  %s345_s7 = scalar_lea.sflag [#allocation4], %s4043_s24  ;;  %s356_s30 = int_to_ptr.vmem [resolvable:$true] %s355_s30 }
  0x59   : > { %s3674_s19 = scalar_lea.vmem %s356_s30, 4096  ;;  %s3881_s15 = smov [#allocation3]  }
  0x5a   : > { %p3675_p1 = scmp.ne.s32.totalorder %s356_s30, %s3674_s19  ;;  %s3679_s16 = sshll.u32 %s3881_s15, 4  ;;  %s3680_s16 = int_to_ptr.vmem [resolvable:$false] %s3679_s16 }
  0x5b   : > { %s354_s0 = scalar_lea.hbm %s4669_s3, %s4668_s25  ;;  %s3681_s4 = scalar_lea.vmem %s3680_s16, 8192 }
  0x5c   : > { %p3677_p7 = pnand %p3675_p1, %p4072_p3  ;;  %p3682_p5 = scmp.lt.s32.totalorder %s356_s30, %s3680_s16 }
  0x5d   : > { %p3683_p10 = scmp.lt.s32.totalorder %s3681_s4, %s3674_s19 }
  0x5e   : > { %p3678_p9 = pneg %p3677_p7 }
  0x5f   : > { %p3684_p11 = por %p3683_p10, %p3682_p5 }
  0x61   : > { %p3685_p13 = pnand %p3684_p11, %p3678_p9 }
  0x63   : > { %3688 = shalt.err (!%p3685_p13)
}
  0x64   : > { %3279 = dma.hbm_to_vmem [thread:$0]  (!%p4053_p4), %s354_s0, 4096, %s356_s30, %s345_s7, %s3879_s27, %s3879_s27, %s3880_s2  }
  0x65   : > { %s4671_s5 = sld [smem:[#allocation35_spill]]  ;;  %s390_s21 = scalar_lea.vmem [#allocation8], %s3261_s14 }
  0x66   : > { %s397_s23 = sshll.u32 %s390_s21, 4  ;;  %s3882_s15 = smov [#allocation8]   ;;  %s398_s23 = int_to_ptr.vmem [resolvable:$true] %s397_s23 }
  0x67   : > { %s3702_s11 = scalar_lea.vmem %s398_s23, 3072  ;;  %s3707_s16 = sshll.u32 %s3882_s15, 4  ;;  %s3708_s16 = int_to_ptr.vmem [resolvable:$false] %s3707_s16 }
  0x68   : > { %p3703_p0 = scmp.ne.s32.totalorder %s398_s23, %s3702_s11  ;;  %s3709_s19 = scalar_lea.vmem %s3708_s16, 6144 }
  0x69   : > { %p3710_p9 = scmp.lt.s32.totalorder %s398_s23, %s3708_s16  ;;  %p3711_p5 = scmp.lt.s32.totalorder %s3709_s19, %s3702_s11 }
  0x6a   : > { %p3705_p1 = pnand %p3703_p0, %p4072_p3 }
  0x6b   : > { %s396_s12 = scalar_lea.hbm %s4671_s5, %s3262_s18  ;;  %p3712_p10 = por %p3711_p5, %p3710_p9 }
  0x6c   : > { %p3706_p7 = pneg %p3705_p1 }
  0x6e   : > { %p3713_p11 = pnand %p3712_p10, %p3706_p7 }
  0x70   : > { %3716 = shalt.err (!%p3713_p11)
}
  0x71   : > { %s3883_s7 = smov 192   ;;  %s3884_s18 = smov 12  }
  0x72   : > { %3285 = dma.hbm_to_vmem [thread:$0]  (!%p4053_p4), %s396_s12, 3072, %s398_s23, %s4068_s29, %s3883_s7, %s3883_s7, %s3884_s18  }
  0x73   : > { %s2855_s27 = sshll.u32 %s4043_s24, 6  ;;  %s3062_s2 = sshll.u32 %s3865_s17, 10 }
  0x74   : > { %s4672_s8 = sld [smem:[#allocation38_spill]]  ;;  %s440_s4 = scalar_lea.vmem [#allocation11], %s2855_s27 }
  0x75   : > { %s447_s6 = sshll.u32 %s440_s4, 4  ;;  %s3885_s21 = smov [#allocation11]   ;;  %s448_s6 = int_to_ptr.vmem [resolvable:$true] %s447_s6 }
  0x76   : > { %s3730_s25 = scalar_lea.vmem %s448_s6, 1024  ;;  %s3735_s11 = sshll.u32 %s3885_s21, 4  ;;  %s3736_s11 = int_to_ptr.vmem [resolvable:$false] %s3735_s11 }
  0x77   : > { %p3731_p13 = scmp.ne.s32.totalorder %s448_s6, %s3730_s25  ;;  %s3737_s15 = scalar_lea.vmem %s3736_s11, 2048 }
  0x78   : > { %p3738_p7 = scmp.lt.s32.totalorder %s448_s6, %s3736_s11  ;;  %p3739_p9 = scmp.lt.s32.totalorder %s3737_s15, %s3730_s25 }
  0x79   : > { %p3733_p0 = pnand %p3731_p13, %p4072_p3 }
  0x7a   : > { %s446_s14 = scalar_lea.hbm %s4672_s8, %s3062_s2  ;;  %p3740_p5 = por %p3739_p9, %p3738_p7 }
  0x7b   : > { %p3734_p1 = pneg %p3733_p0 }
  0x7d   : > { %p3741_p10 = pnand %p3740_p5, %p3734_p1 }
  0x7f   : > { %3744 = shalt.err (!%p3741_p10)
}
  0x80   : > { %s4673_s24 = smov 4   ;;  %s4674_s29 = smov 64  }
  0x81   : > { %3291 = dma.hbm_to_vmem [thread:$0]  (!%p4053_p4), %s446_s14, 1024, %s448_s6, %s4098_s1, %s4674_s29, %s4674_s29, %s4673_s24  }
  0x82   : > { %459 = sbr.rel (%p4087_p6) target bundleno = 4790 (0x12b6), region = 56  ;;  %s4143_s26 = sand.u32 (!%p4087_p6), 1, %s3849_s13  }
  0x83   : > { %s2859_s12 = sshll.u32 (!%p4087_p6), %s4143_s26, 8  ;;  %s462_s23 = scalar_lea.sflag (!%p4087_p6), [#allocation4], %s4143_s26 }
  0x84   : > { %s4147_s16 = scalar_lea.vmem (!%p4087_p6), [#allocation3], %s2859_s12 }
  0x87   : > { %3816 = dma.done.wait (%p4022_p8), %s462_s23, 4096  }
  0x88   : > { %3818 = vsyncadd (%p4022_p8), %s462_s23, 4294963200  ;;  %s470_s1 = sand.u32 1, %s3997_s20   ;;  %s4154_s9 = scalar_lea.vmem [#allocation6], %s2859_s12 }
  0x89   : > { %s471_s22 = scalar_lea.sflag [#allocation7], %s470_s1 }
  0x8a   : > { %3820 = dma.done.wait (%p4022_p8), %s471_s22, 7168  }
  0x8b   : > { %3822 = vsyncadd (%p4022_p8), %s471_s22, 4294960128  ;;  %s3263_s19 = smul.u32 192, %s4143_s26  ;;  %s2861_s7 = sshll.u32 %s4143_s26, 7 }
  0x8c   : > { %s489_s27 = scalar_lea.sflag [#allocation10], %s470_s1  ;;  %s4164_s2 = scalar_lea.vmem [#allocation9], %s2861_s7 }
  0x8d   : > { %s4162_s18 = scalar_lea.vmem [#allocation8], %s3263_s19 }
  0x8e   : > { %3824 = dma.done.wait (%p4022_p8), %s489_s27, 3072  }
  0x8f   : > { %3826 = vsyncadd (%p4022_p8), %s489_s27, 4294964224  ;;  %s4675_s20 = sld [smem:[#allocation21_spill]]  ;;  %s2862_s30 = sshll.u32 %s4143_s26, 6 }
  0x90   : > { %s4676_s0 = sld [smem:[#allocation20_spill]]  ;;  %s4634_s14 = sand.u32 1, %s3837_s10  }
  0x91   : > { %s4174_s4 = sshll.u32 %s4634_s14, 3  ;;  %s4677_s11 = sld [smem:[#allocation30_spill]] }
  0x92   : > { %s4678_s23 = sld [smem:[#allocation31_spill]]  ;;  %s4198_s28 = scalar_lea.vmem [#allocation11], %s2862_s30 }
  0x93   : > { %s4679_s7 = sld [smem:[#allocation32_spill]] }
  0x95   : > { %p575_p4 = scmp.lt.s32.totalorder %s4675_s20, 1 }
  0x96   : > { %p579_p3 = scmp.lt.s32.totalorder %s4676_s0, 1  ;;  %p2871_p8 = scmp.ne.s32.totalorder %s4676_s0, 0 }
  0x97   : > { %s4711_s20 = smov (!%p575_p4, %s4675_s20), 1 }
  0x98   : > { %s580_s6 = scalar_select %p579_p3, %s4676_s0, 1 }
  0x99   : > { %s2864_s25 = sshll.u32 %s4711_s20, 3  ;;  %s4680_s20 = sld [smem:[#allocation36_spill]] }
  0x9a   : > { %s578_s15 = scalar_lea.vmem %s4677_s11, %s2864_s25  ;;  %s3063_s24 = sshll.u32 %s580_s6, 5 }
  0x9b   : > { %s4186_s1 = scalar_lea.vmem %s4678_s23, %s3063_s24  ;;  %s3064_s26 = sshll.u32 %s580_s6, 2 }
  0x9c   : > { %s4191_s27 = scalar_lea.vmem %s4679_s7, %s3064_s26  ;;  %s3065_s14 = sshll.u32 %s580_s6, 6 }
  0x9d   : > { %s574_s25 = scalar_lea.vmem [#allocation12], %s4174_s4  ;;  %598 = sbr.rel (%p2871_p8) target bundleno = 164 (0xa4), region = 80 }
  0x9f   : > { %s4196_s8 = scalar_lea.vmem %s4680_s20, %s3065_s14 }
  0xa2   : > { %v599_v0 = vld [vmem:[%s578_s15] sm:$0xff] }
  0xa3   : > { %600 = vst [vmem:[#allocation2] sm:$0xff] %v599_v0 }
  0xa4 PF: > { %v3398_v2 = vld [vmem:[%s4147_s16 + $0x74] ss:$8 sps:$4 sm:$0xff]   ;;  %v3400_v3 = vld [vmem:[%s4147_s16 + $0x70] ss:$8 sps:$4 sm:$0xff]   ;;  %v3401_v4 = vld [vmem:[%s4147_s16 + $0x64] ss:$8 sps:$4 sm:$0xff]   ;;  %v619_v26 = vlaneseq }
  0xa5   : > { %v3403_v5 = vld [vmem:[%s4147_s16 + $0x60] ss:$8 sps:$4 sm:$0xff]   ;;  %745 = vmatprep.subr.bf16.mxu0 %v3398_v2  ;;  %v3404_v10 = vld [vmem:[%s4147_s16 + $0x54] ss:$8 sps:$4 sm:$0xff]   ;;  %v3406_v11 = vld [vmem:[%s4147_s16 + $0x50] ss:$8 sps:$4 sm:$0xff]  }
  0xa6   : > { %746 = vmatpush1.bf16.msra.mxu0 %v3400_v3  ;;  %v3407_v12 = vld [vmem:[%s4147_s16 + $0x44] ss:$8 sps:$4 sm:$0xff]   ;;  %v3409_v13 = vld [vmem:[%s4147_s16 + $0x40] ss:$8 sps:$4 sm:$0xff]   ;;  %v3410_v14 = vld [vmem:[%s4147_s16 + $0x34] ss:$8 sps:$4 sm:$0xff]  }
  0xa7   : > { %747 = vmatprep.subr.bf16.mxu0 %v3401_v4  ;;  %v3412_v15 = vld [vmem:[%s4147_s16 + $0x30] ss:$8 sps:$4 sm:$0xff]   ;;  %v3413_v16 = vld [vmem:[%s4147_s16 + $0x24] ss:$8 sps:$4 sm:$0xff]   ;;  %v3886_v17 = vmov 0   ;;  %v4223_v27 = vshrl.u32 %v619_v26, 7 }
  0xa8   : > { %777 = vmatprep.mubr.bf16.mxu0 %v3886_v17  ;;  %v3415_v18 = vld [vmem:[%s4147_s16 + $0x20] ss:$8 sps:$4 sm:$0xff]   ;;  %v3416_v19 = vld [vmem:[%s4147_s16 + $0x14] ss:$8 sps:$4 sm:$0xff]   ;;  %v3418_v20 = vld [vmem:[%s4147_s16 + $0x10] ss:$8 sps:$4 sm:$0xff]  }
  0xa9   : > { %v3419_v21 = vld [vmem:[%s4147_s16 + $0x4] ss:$8 sps:$4 sm:$0xff]   ;;  %v3421_v22 = vld [vmem:[%s4147_s16] ss:$8 sps:$4 sm:$0xff]   ;;  %v4226_v28 = vsub.s32 0, %v4223_v27  ;;  %v4229_v29 = vld [vmem:[%s4186_s1] sm:$0xff] }
  0xaa   : > { %v4202_v1 = vld [vmem:[#allocation2] sm:$0xff]  ;;  %748 = vmatpush1.bf16.msra.mxu0 %v3403_v5  ;;  %v4232_v30 = vsub.s32 1, %v4223_v27  ;;  %v3424_v40 = vld [vmem:[%s4154_s9 + $0x70] sm:$0xff]   ;;  %v3426_v42 = vld [vmem:[%s4154_s9 + $0x68] sm:$0xff]   ;;  %v4257_v55 = vsub.s32 2, %v4223_v27  ;;  %vm3888_vm0 = vmmov 0  }
  0xab   : > { %607 = vadd.xlane.f32.xlu0 %v4202_v1  ;;  %749 = vmatprep.subr.bf16.mxu0 %v3404_v10  ;;  %v622_v31 = vrot.slane %v4229_v29, %v4226_v28  ;;  %v3422_v38 = vld [vmem:[%s4154_s9 + $0x78] sm:$0xff]   ;;  %v3425_v41 = vld [vmem:[%s4154_s9 + $0x30] sm:$0xff]   ;;  %v3427_v43 = vld [vmem:[%s4154_s9 + $0x28] sm:$0xff]   ;;  %vm1535_vm1 = vcmask 1043456   ;;  %s3889_s3 = smov 96   ;;  %vm1294_vm2 = vcmask 261120  }
  0xac   : > { %v627_v34 = vrot.slane %v4229_v29, %v4232_v30  ;;  %v3423_v39 = vld [vmem:[%s4154_s9 + $0x38] sm:$0xff]   ;;  %3066 = vmatprep.subr.bf16.mxu1 %v3422_v38  ;;  %v3428_v44 = vld [vmem:[%s4154_s9 + $0x60] sm:$0xff]   ;;  %v3432_v48 = vld [vmem:[%s4154_s9 + $0x50] sm:$0xff]   ;;  %s3890_s5 = smov 64   ;;  %vm1479_vm3 = vcmask 64512   ;;  %vm1730_vm4 = vcmask 523264  }
  0xad   : > { %3067 = vmatpush3.bf16.msra.mxu1 %v3423_v39  ;;  %v3429_v45 = vld [vmem:[%s4154_s9 + $0x20] sm:$0xff]   ;;  %v3430_v46 = vld [vmem:[%s4154_s9 + $0x58] sm:$0xff]   ;;  %v3433_v49 = vld [vmem:[%s4154_s9 + $0x10] sm:$0xff]   ;;  %vm1732_vm5 = vcmask 785408   ;;  %vm2023_vm6 = vcmp.eq.s32.totalorder %v4223_v27, 0  ;;  %vm2028_vm7 = vcmp.eq.s32.totalorder %v4223_v27, 7 }
  0xae   : > { %750 = vmatpush1.bf16.msra.mxu0 %v3406_v11  ;;  %3068 = vmatprep.subr.bf16.mxu1 %v3424_v40  ;;  %v3431_v47 = vld [vmem:[%s4154_s9 + $0x18] sm:$0xff]   ;;  %v3434_v50 = vld [vmem:[%s4154_s9 + $0x48] sm:$0xff]   ;;  %v3436_v52 = vld [vmem:[%s4154_s9 + $0x40] sm:$0xff]  }
  0xaf   : > { %751 = vmatprep.subr.bf16.mxu0 %v3407_v12  ;;  %v3435_v51 = vld [vmem:[%s4154_s9 + $0x8] sm:$0xff]   ;;  %v3437_v53 = vld [vmem:[%s4154_s9] sm:$0xff]   ;;  %v606_v54 = vld [vmem:[%s4191_s27] sm:$0xf] }
  0xb0   : > { %v650_v56 = vrot.slane %v606_v54, %v4226_v28  ;;  %v654_v57 = vrot.slane %v606_v54, %v4257_v55  ;;  %v3440_v26 = vld [vmem:[%s4162_s18 + $0xac] ss:$12 sps:$4 sm:$0xff]   ;;  %v3448_v39 = vld [vmem:[%s4162_s18 + $0x7c] ss:$12 sps:$4 sm:$0xff]   ;;  %v3468_v54 = vld [vmem:[%s4162_s18 + $0x4] ss:$12 sps:$4 sm:$0xff]  }
  0xb1   : > { %3069 = vmatpush3.bf16.msra.mxu1 %v3425_v41  ;;  %v3446_v40 = vld [vmem:[%s4162_s18 + $0x78] ss:$12 sps:$4 sm:$0xff]   ;;  %v3449_v41 = vld [vmem:[%s4162_s18 + $0x80] ss:$12 sps:$4 sm:$0xff]  }
  0xb2   : > { %752 = vmatpush1.bf16.msra.mxu0 %v3409_v13  ;;  %3070 = vmatprep.subr.bf16.mxu1 %v3426_v42  ;;  %v660_v58 = vrot.slane %v650_v56, %v4226_v28  ;;  %v664_v59 = vrot.slane %v654_v57, %v4226_v28  ;;  %v3450_v42 = vld [vmem:[%s4162_s18 + $0x60] ss:$12 sps:$4 sm:$0xff]   ;;  %v3469_v57 = vld [vmem:[%s4162_s18 + $0x8] ss:$12 sps:$4 sm:$0xff]  }
  0xb3   : > { %753 = vmatprep.subr.bf16.mxu0 %v3410_v14  ;;  %v3466_v56 = vld [vmem:[%s4162_s18] ss:$12 sps:$4 sm:$0xff]  }
  0xb5   : > { %3071 = vmatpush3.bf16.msra.mxu1 %v3427_v43  ;;  %v3452_v43 = vld [vmem:[%s4162_s18 + $0x64] ss:$12 sps:$4 sm:$0xff]  }
  0xb6   : > { %754 = vmatpush1.bf16.msra.mxu0 %v3412_v15  ;;  %3072 = vmatprep.subr.bf16.mxu1 %v3428_v44  ;;  %v3453_v44 = vld [vmem:[%s4162_s18 + $0x68] ss:$12 sps:$4 sm:$0xff]  }
  0xb7   : > { %755 = vmatprep.subr.bf16.mxu0 %v3413_v16  ;;  %v837_v16 = vrot.slane %v4229_v29, %v4257_v55 }
  0xb9   : > { %3073 = vmatpush3.bf16.msra.mxu1 %v3429_v45  ;;  %v3456_v45 = vld [vmem:[%s4162_s18 + $0x4c] ss:$12 sps:$4 sm:$0xff]  }
  0xba   : > { %756 = vmatpush1.bf16.msra.mxu0 %v3415_v18  ;;  %3074 = vmatprep.subr.bf16.mxu1 %v3430_v46  ;;  %v3454_v46 = vld [vmem:[%s4162_s18 + $0x48] ss:$12 sps:$4 sm:$0xff]  }
  0xbb   : > { %757 = vmatprep.subr.bf16.mxu0 %v3416_v19 }
  0xbd   : > { %3075 = vmatpush3.bf16.msra.mxu1 %v3431_v47  ;;  %v3457_v47 = vld [vmem:[%s4162_s18 + $0x50] ss:$12 sps:$4 sm:$0xff]  }
  0xbe   : > { %758 = vmatpush1.bf16.msra.mxu0 %v3418_v20  ;;  %3076 = vmatprep.subr.bf16.mxu1 %v3432_v48  ;;  %v3460_v48 = vld [vmem:[%s4162_s18 + $0x34] ss:$12 sps:$4 sm:$0xff]  }
  0xbf   : > { %759 = vmatprep.subr.bf16.mxu0 %v3419_v21 }
  0xc1   : > { %3077 = vmatpush3.bf16.msra.mxu1 %v3433_v49  ;;  %v3458_v49 = vld [vmem:[%s4162_s18 + $0x30] ss:$12 sps:$4 sm:$0xff]  }
  0xc2   : > { %760 = vmatpush1.bf16.msra.mxu0 %v3421_v22  ;;  %3078 = vmatprep.subr.bf16.mxu1 %v3434_v50  ;;  %v3461_v50 = vld [vmem:[%s4162_s18 + $0x38] ss:$12 sps:$4 sm:$0xff]  }
  0xc3   : > { %1175 = vmatprep.subr.bf16.mxu0 %v3440_v26 }
  0xc5   : > { %3079 = vmatpush3.bf16.msra.mxu1 %v3435_v51  ;;  %v3464_v51 = vld [vmem:[%s4162_s18 + $0x1c] ss:$12 sps:$4 sm:$0xff]  }
  0xc6   : > { %3080 = vmatprep.subr.bf16.mxu1 %v3436_v52  ;;  %v3462_v52 = vld [vmem:[%s4162_s18 + $0x18] ss:$12 sps:$4 sm:$0xff]  }
  0xc9   : > { %3081 = vmatpush3.bf16.msra.mxu1 %v3437_v53  ;;  %v3465_v53 = vld [vmem:[%s4162_s18 + $0x20] ss:$12 sps:$4 sm:$0xff]  }
 0x134   : > { %v608_v6 = vpop.xlane.xlu0 %607 }
 0x135   : > { %v610_v7 = vmul.f32 0.0078125, %v608_v6 }
 0x137   : > { %v611_v8 = vsub.f32 %v4202_v1, %v610_v7 }
 0x139   : > { %v612_v9 = vmul.f32 %v611_v8, %v611_v8 }
 0x13b   : > { %613 = vadd.xlane.f32.xlu0 %v612_v9 }
 0x1c4   : > { %v614_v23 = vpop.xlane.xlu0 %613 }
 0x1c5   : > { %v615_v24 = vmul.f32 0.0078125, %v614_v23 }
 0x1c7   : > { %v616_v25 = vadd.f32 1e-05, %v615_v24 }
 0x1c9   : > { %3550 = vrsqrt.f32 %v616_v25  ;;  %v3438_v25 = vld [vmem:[%s4162_s18 + $0xa8] ss:$12 sps:$4 sm:$0xff]  }
 0x1d6   : > { %v3551_v32 = vpop.eup %3550 }
 0x1d7   : > { %v618_v33 = vmul.f32 %v3551_v32, %v611_v8  ;;  %v3441_v32 = vld [vmem:[%s4162_s18 + $0xb0] ss:$12 sps:$4 sm:$0xff]  }
 0x1d9   : > { %v623_v35 = vmul.f32 %v622_v31, %v618_v33  ;;  %v3887_v31 = vmov 0.0   ;;  %v3444_v33 = vld [vmem:[%s4162_s18 + $0x94] ss:$12 sps:$4 sm:$0xff]  }
 0x1da   : > { %3153 = vmatprep.subr.bf16.mxu1 %v3887_v31 }
 0x1db   : > { %v628_v36 = vadd.f32 %v627_v34, %v623_v35  ;;  %v3442_v34 = vld [vmem:[%s4162_s18 + $0x90] ss:$12 sps:$4 sm:$0xff]   ;;  %v3445_v35 = vld [vmem:[%s4162_s18 + $0x98] ss:$12 sps:$4 sm:$0xff]   ;;  %s3891_s18 = smov 32  }
 0x1dd   : > { %v645_v37 = vpack.c.bf16 %v628_v36, %v628_v36 }
 0x1df   : > { %778 = vmatmul.mubr.bf16.vlgmr.msra.gmra.mxu0 %v645_v37 }
 0x1e0   : > { %1207 = vmatprep.mubr.bf16.mxu0 %v3886_v17  ;;  %1176 = vmatpush1.bf16.msra.mxu0 %v3438_v25 }
 0x1e1   : > { %1177 = vmatprep.subr.bf16.mxu0 %v3444_v33 }
 0x1e4   : > { %1178 = vmatpush1.bf16.msra.mxu0 %v3442_v34 }
 0x1e5   : > { %1179 = vmatprep.subr.bf16.mxu0 %v3448_v39 }
 0x1e8   : > { %1180 = vmatpush1.bf16.msra.mxu0 %v3446_v40 }
 0x1e9   : > { %1181 = vmatprep.subr.bf16.mxu0 %v3452_v43 }
 0x1ec   : > { %1182 = vmatpush1.bf16.msra.mxu0 %v3450_v42 }
 0x1ed   : > { %1183 = vmatprep.subr.bf16.mxu0 %v3456_v45 }
 0x1f0   : > { %1184 = vmatpush1.bf16.msra.mxu0 %v3454_v46 }
 0x1f1   : > { %1185 = vmatprep.subr.bf16.mxu0 %v3460_v48 }
 0x1f4   : > { %1186 = vmatpush1.bf16.msra.mxu0 %v3458_v49 }
 0x1f5   : > { %1187 = vmatprep.subr.bf16.mxu0 %v3464_v51 }
 0x1f8   : > { %1188 = vmatpush1.bf16.msra.mxu0 %v3462_v52 }
 0x1f9   : > { %1189 = vmatprep.subr.bf16.mxu0 %v3468_v54 }
 0x1fc   : > { %1190 = vmatpush1.bf16.msra.mxu0 %v3466_v56 }
 0x1fd   : > { %3197 = vmatprep.subr.bf16.mxu0 %v3887_v31 }
 0x29f   : > { %v779_v60 = vpop.f32.mrf.mxu0 }
 0x2a0   : > { %v780_v61 = vadd.f32 %v779_v60, %v660_v58 }
 0x2a1   : > { %v781_v62 = vpop.f32.mrf.mxu0 }
 0x2a2   : > { %v2888_v63 = vmul.f32 -1.442695, %v780_v61  ;;  %v782_v0 = vadd.f32 %v781_v62, %v664_v59  ;;  %v4310_v62 = vsub.s32 4, %v4223_v27 }
 0x2a3   : > { %v783_v2 = vpop.f32.mrf.mxu0 }
 0x2a4   : > { %3552 = vpow2.f32 %v2888_v63  ;;  %v2889_v3 = vmul.f32 -1.442695, %v782_v0 }
 0x2a5   : > { %v784_v4 = vpop.f32.mrf.mxu0 }
 0x2a6   : > { %3554 = vpow2.f32 %v2889_v3  ;;  %v995_v3 = vrot.slane %v4229_v29, %v4310_v62 }
 0x2b1   : > { %v3553_v5 = vpop.eup %3552 }
 0x2b2   : > { %v792_v6 = vadd.f32 1.0, %v3553_v5 }
 0x2b3   : > { %v3555_v7 = vpop.eup %3554 }
 0x2b4   : > { %3556 = vrcp.f32 %v792_v6  ;;  %v793_v8 = vadd.f32 1.0, %v3555_v7  ;;  %v4321_v7 = vsub.s32 5, %v4223_v27 }
 0x2b6   : > { %3558 = vrcp.f32 %v793_v8  ;;  %v1000_v8 = vrot.slane %v4229_v29, 2 }
 0x2c1   : > { %v3557_v9 = vpop.eup %3556 }
 0x2c2   : > { %v798_v11 = vmul.f32 %v3557_v9, %v780_v61  ;;  %v4307_v61 = vsub.s32 3, %v4223_v27  ;;  %v998_v9 = vrot.slane %v4229_v29, 1 }
 0x2c3   : > { %v3559_v10 = vpop.eup %3558 }
 0x2c4   : > { %v799_v12 = vmul.f32 %v3559_v10, %v782_v0  ;;  %v832_v14 = vpack.c.bf16 %v798_v11, %v798_v11  ;;  %v990_v63 = vrot.slane %v4229_v29, %v4307_v61  ;;  %v1038_v10 = vrot.slane %v4229_v29, %v4321_v7 }
 0x2c5   : > { %v1046_v11 = vrot.slane %v1000_v8, %v4321_v7 }
 0x2c6   : > { %v833_v13 = vpack.c.bf16 %v799_v12, %v799_v12  ;;  %v1042_v12 = vrot.slane %v998_v9, %v4321_v7 }
 0x2c8   : > { %966 = vmatprep.mubr.bf16.mxu1 %v833_v13 }
 0x2c9   : > { %967 = vmatmul.mubr.bf16.vlgmr.msra.gmra.mxu1 %v832_v14 }
 0x2ca   : > { %3154 = vmatpush3.bf16.msra.mxu1 %v3441_v32  ;;  %3169 = vmatprep.mubr.msk.bf16.mxu1 %vm3888_vm0, %v3887_v31 }
 0x2cb   : > { %3155 = vmatprep.subr.bf16.mxu1 %v3887_v31 }
 0x2ce   : > { %3156 = vmatpush3.bf16.msra.mxu1 %v3445_v35 }
 0x2cf   : > { %3157 = vmatprep.subr.bf16.mxu1 %v3887_v31 }
 0x2d2   : > { %3158 = vmatpush3.bf16.msra.mxu1 %v3449_v41 }
 0x2d3   : > { %3159 = vmatprep.subr.bf16.mxu1 %v3887_v31 }
 0x2d6   : > { %3160 = vmatpush3.bf16.msra.mxu1 %v3453_v44 }
 0x2d7   : > { %3161 = vmatprep.subr.bf16.mxu1 %v3887_v31 }
 0x2da   : > { %3162 = vmatpush3.bf16.msra.mxu1 %v3457_v47 }
 0x2db   : > { %3163 = vmatprep.subr.bf16.mxu1 %v3887_v31 }
 0x2de   : > { %3164 = vmatpush3.bf16.msra.mxu1 %v3461_v50 }
 0x2df   : > { %3165 = vmatprep.subr.bf16.mxu1 %v3887_v31 }
 0x2e2   : > { %3166 = vmatpush3.bf16.msra.mxu1 %v3465_v53 }
 0x2e3   : > { %3167 = vmatprep.subr.bf16.mxu1 %v3887_v31 }
 0x2e6   : > { %3168 = vmatpush3.bf16.msra.mxu1 %v3469_v57 }
 0x2e7   : > { %3173 = vmatprep.subr.bf16.mxu1 %v3887_v31 }
 0x389   : > { %v3082_v15 = vpop.f32.mrf.mxu1 }
 0x38b   : > { %v3083_v18 = vpop.f32.mrf.mxu1 }
 0x38c   : > { %v3084_v19 = vadd.f32 %v3083_v18, %v3082_v15 }
 0x38d   : > { %v3085_v20 = vpop.f32.mrf.mxu1 }
 0x38e   : > { %v969_v21 = vadd.f32 %v3084_v19, %v837_v16 }
 0x38f   : > { %v3086_v22 = vpop.f32.mrf.mxu1 }
 0x390   : > { %v974_v23 = vmul.f32 0.5, %v969_v21 }
 0x392   : > { %v4266_v24 = vadd.f32 %v974_v23, %v4202_v1 }
 0x394   : > { %976 = vadd.xlane.f32.xlu1 %v4266_v24 }
 0x41d   : > { %v977_v1 = vpop.xlane.xlu1 %976 }
 0x41e   : > { %v978_v36 = vmul.f32 0.0078125, %v977_v1 }
 0x420   : > { %v979_v37 = vsub.f32 %v4266_v24, %v978_v36 }
 0x422   : > { %v980_v38 = vmul.f32 %v979_v37, %v979_v37 }
 0x424   : > { %981 = vadd.xlane.f32.xlu1 %v980_v38 }
 0x4ad   : > { %v982_v58 = vpop.xlane.xlu1 %981 }
 0x4ae   : > { %v983_v59 = vmul.f32 0.0078125, %v982_v58 }
 0x4b0   : > { %v984_v60 = vadd.f32 1e-05, %v983_v59 }
 0x4b2   : > { %3560 = vrsqrt.f32 %v984_v60 }
 0x4bf   : > { %v3561_v0 = vpop.eup %3560 }
 0x4c0   : > { %v986_v2 = vmul.f32 %v3561_v0, %v979_v37 }
 0x4c2   : > { %v991_v4 = vmul.f32 %v990_v63, %v986_v2 }
 0x4c4   : > { %v996_v5 = vadd.f32 %v995_v3, %v991_v4 }
 0x4c6   : > { %v1034_v6 = vpack.c.bf16 %v996_v5, %v996_v5 }
 0x4c8   : > { %1208 = vmatmul.mubr.bf16.vlgmr.msra.gmra.mxu0 %v1034_v6  ;;  %3170 = vmatmul.mubr.bf16.vlgmr.msra.gmra.mxu1 %v1034_v6 }
 0x4c9   : > { %3175 = vmatprep.mubr.msk.bf16.mxu1 %vm3888_vm0, %v3887_v31  ;;  %3199 = vmatprep.mubr.msk.bf16.mxu0 %vm3888_vm0, %v3887_v31 }
 0x588   : > { %v1209_v13 = vpop.f32.mrf.mxu0  ;;  %v1250_v14 = vpop.f32.mrf.mxu1 }
 0x589   : > { %v1210_v15 = vadd.f32 %v1209_v13, %v1038_v10  ;;  %v4329_v16 = vadd.f32 %v1250_v14, %v1046_v11 }
 0x58a   : > { %v1211_v18 = vpop.f32.mrf.mxu0  ;;  %v3171_v19 = vpop.f32.mrf.mxu1 }
 0x58b   : > { %v1212_v20 = vadd.f32 %v1211_v18, %v1042_v12  ;;  %1257 = vrot.lane.b32.xlu1 %v1210_v15, %s3889_s3  ;;  %v1528_v21 = vpack.c.bf16 %v4329_v16, %v4329_v16  ;;  %v1286_v34 = vpack.c.bf16 %v1210_v15, %v1210_v15 }
 0x58c   : > { %v1213_v29 = vpop.f32.mrf.mxu0  ;;  %v1253_v22 = vpop.f32.mrf.mxu1 }
 0x58d   : > { %1267 = vrot.lane.b32.xlu0 %v1212_v20, %s3889_s3  ;;  %v1537_v23 = vsel %vm1535_vm1, %v1528_v21, 0  ;;  %v1290_v25 = vpack.c.bf16 %v1212_v20, %v1212_v20 }
 0x58e   : > { %v1214_v26 = vpop.f32.mrf.mxu0  ;;  %v3172_v32 = vpop.f32.mrf.mxu1  ;;  %3198 = vmatpush3.bf16.msra.mxu0 %v1537_v23 }
 0x58f   : > { %1270 = vrot.lane.b32.xlu1 %v1212_v20, %s3890_s5  ;;  %v1299_v33 = vsel %vm1294_vm2, %v1290_v25, 0  ;;  %3209 = vmatprep.subr.bf16.mxu0 %v3887_v31 }
 0x590   : > { %3174 = vmatpush3.bf16.xpose.msra.mxu1 %v1299_v33 }
 0x591   : > { %1273 = vrot.lane.b32.xlu0 %v1212_v20, %s3891_s18  ;;  %3179 = vmatprep.subr.bf16.mxu1 %v3887_v31 }
 0x593   : > { %1260 = vrot.lane.b32.xlu1 %v1210_v15, %s3890_s5 }
 0x597   : > { %1263 = vrot.lane.b32.xlu1 %v1210_v15, %s3891_s18  ;;  %3176 = vmatmul.mubr.msk.bf16.vlgmr.msra.gmra.mxu1 %vm1294_vm2, %v1286_v34 }
 0x598   : > { %3181 = vmatprep.mubr.msk.bf16.mxu1 %vm3888_vm0, %v3887_v31 }
 0x5fd   : > { %v1258_v35 = vpop.permute.xlu1 %1257 }
 0x5fe   : > { %v1287_v40 = vpack.c.bf16 %v1258_v35, %v1258_v35 }
 0x5ff   : > { %v1268_v1 = vpop.permute.xlu0 %1267 }
 0x600   : > { %v1291_v36 = vpack.c.bf16 %v1268_v1, %v1268_v1 }
 0x601   : > { %v1271_v38 = vpop.permute.xlu1 %1270 }
 0x602   : > { %v1345_v37 = vsel %vm1294_vm2, %v1291_v36, 0  ;;  %v1292_v39 = vpack.c.bf16 %v1271_v38, %v1271_v38 }
 0x603   : > { %3180 = vmatpush3.bf16.xpose.msra.mxu1 %v1345_v37  ;;  %v1274_v42 = vpop.permute.xlu0 %1273 }
 0x604   : > { %3185 = vmatprep.subr.bf16.mxu1 %v3887_v31  ;;  %v1391_v41 = vsel %vm1294_vm2, %v1292_v39, 0  ;;  %v1293_v44 = vpack.c.bf16 %v1274_v42, %v1274_v42 }
 0x605   : > { %v1261_v43 = vpop.permute.xlu1 %1260 }
 0x606   : > { %v1288_v45 = vpack.c.bf16 %v1261_v43, %v1261_v43  ;;  %v1437_v46 = vsel %vm1294_vm2, %v1293_v44, 0 }
 0x609   : > { %v1264_v47 = vpop.permute.xlu1 %1263 }
 0x60a   : > { %3182 = vmatmul.mubr.msk.bf16.vlgmr.msra.gmra.mxu1 %vm1294_vm2, %v1287_v40  ;;  %v1289_v48 = vpack.c.bf16 %v1264_v47, %v1264_v47 }
 0x60b   : > { %3186 = vmatpush3.bf16.xpose.msra.mxu1 %v1391_v41  ;;  %3187 = vmatprep.mubr.msk.bf16.mxu1 %vm3888_vm0, %v3887_v31 }
 0x60c   : > { %3191 = vmatprep.subr.bf16.mxu1 %v3887_v31 }
 0x612   : > { %3188 = vmatmul.mubr.msk.bf16.vlgmr.msra.gmra.mxu1 %vm1294_vm2, %v1288_v45 }
 0x613   : > { %3192 = vmatpush3.bf16.xpose.msra.mxu1 %v1437_v46  ;;  %3193 = vmatprep.mubr.msk.bf16.mxu1 %vm3888_vm0, %v3887_v31 }
 0x614   : > { %3203 = vmatprep.subr.bf16.mxu1 %v3887_v31 }
 0x61a   : > { %3194 = vmatmul.mubr.msk.bf16.vlgmr.msra.gmra.mxu1 %vm1294_vm2, %v1289_v48 }
 0x61b   : > { %3205 = vmatprep.mubr.msk.bf16.mxu1 %vm3888_vm0, %v3887_v31 }
 0x657   : > { %v1335_v49 = vpop.f32.mrf.mxu1 }
 0x658   : > { %v1480_v50 = vsel %vm1479_vm3, %v1335_v49, -inf }
 0x659   : > { %1481 = vmax.xlane.f32.xlu0 %v1480_v50  ;;  %v3177_v51 = vpop.f32.mrf.mxu1 }
 0x65b   : > { %v1338_v52 = vpop.f32.mrf.mxu1 }
 0x65d   : > { %v3178_v53 = vpop.f32.mrf.mxu1 }
 0x6ca   : > { %v1381_v54 = vpop.f32.mrf.mxu1 }
 0x6cb   : > { %v1483_v56 = vsel %vm1479_vm3, %v1381_v54, -inf }
 0x6cc   : > { %1484 = vmax.xlane.f32.xlu1 %v1483_v56  ;;  %v3183_v57 = vpop.f32.mrf.mxu1 }
 0x6ce   : > { %v1384_v58 = vpop.f32.mrf.mxu1 }
 0x6d0   : > { %v3184_v59 = vpop.f32.mrf.mxu1 }
 0x6d2   : > { %v1427_v60 = vpop.f32.mrf.mxu1 }
 0x6d3   : > { %v1486_v63 = vsel %vm1479_vm3, %v1427_v60, -inf }
 0x6d4   : > { %1487 = vmax.xlane.f32.xlu0 %v1486_v63  ;;  %v3189_v0 = vpop.f32.mrf.mxu1 }
 0x6d6   : > { %v1430_v2 = vpop.f32.mrf.mxu1 }
 0x6d8   : > { %v3190_v3 = vpop.f32.mrf.mxu1 }
 0x6da   : > { %v1473_v4 = vpop.f32.mrf.mxu1 }
 0x6db   : > { %v1489_v5 = vsel %vm1479_vm3, %v1473_v4, -inf }
 0x6dc   : > { %1490 = vmax.xlane.f32.xlu0 %v1489_v5  ;;  %v3195_v6 = vpop.f32.mrf.mxu1  ;;  %v3471_v5 = vld [vmem:[%s4196_s8 + $0x30] sm:$0xff]  }
 0x6de   : > { %v1476_v8 = vpop.f32.mrf.mxu1 }
 0x6e0   : > { %v3196_v9 = vpop.f32.mrf.mxu1 }
 0x6e1   : > { %v3472_v9 = vld [vmem:[%s4196_s8 + $0x28] sm:$0xff]  }
 0x6e2   : > { %v1482_v10 = vpop.xlane.xlu0 %1481 }
 0x6e3   : > { %v1492_v11 = vsub.f32 %v1335_v49, %v1482_v10 }
 0x6e5   : > { %v1496_v12 = vmul.f32 1.442695, %v1492_v11 }
 0x6e7   : > { %3562 = vpow2.f32 %v1496_v12  ;;  %v3473_v12 = vld [vmem:[%s4196_s8 + $0x20] sm:$0xff]  }
 0x6f4   : > { %v3563_v13 = vpop.eup %3562 }
 0x6f5   : > { %v1504_v14 = vsel %vm1479_vm3, %v3563_v13, 0.0 }
 0x6f6   : > { %1505 = vadd.xlane.f32.xlu0 %v1504_v14 }
 0x755   : > { %v1485_v15 = vpop.xlane.xlu1 %1484 }
 0x756   : > { %v1493_v18 = vsub.f32 %v1381_v54, %v1485_v15  ;;  %v3474_v15 = vld [vmem:[%s4196_s8 + $0x18] sm:$0xff]  }
 0x758   : > { %v1498_v19 = vmul.f32 1.442695, %v1493_v18 }
 0x75a   : > { %3564 = vpow2.f32 %v1498_v19 }
 0x75d   : > { %v1488_v20 = vpop.xlane.xlu0 %1487 }
 0x75e   : > { %v1494_v21 = vsub.f32 %v1427_v60, %v1488_v20  ;;  %v3475_v20 = vld [vmem:[%s4196_s8 + $0x10] sm:$0xff]  }
 0x760   : > { %v1500_v29 = vmul.f32 1.442695, %v1494_v21  ;;  %v3476_v21 = vld [vmem:[%s4196_s8 + $0x8] sm:$0xff]  }
 0x762   : > { %3566 = vpow2.f32 %v1500_v29  ;;  %v3477_v29 = vld [vmem:[%s4196_s8] sm:$0xff]  }
 0x765   : > { %v1491_v32 = vpop.xlane.xlu0 %1490 }
 0x766   : > { %v1495_v34 = vsub.f32 %v1473_v4, %v1491_v32  ;;  %v3470_v4 = vld [vmem:[%s4196_s8 + $0x38] sm:$0xff]   ;;  %s4681_s8 = sld [smem:[#allocation20_spill]] }
 0x767   : > { %v3565_v22 = vpop.eup %3564 }
 0x768   : > { %v1507_v23 = vsel %vm1479_vm3, %v3565_v22, 0.0  ;;  %v1502_v35 = vmul.f32 1.442695, %v1495_v34 }
 0x769   : > { %1508 = vadd.xlane.f32.xlu1 %v1507_v23 }
 0x76c   : > { %p3054_p6 = scmp.ne.s32.totalorder %s4681_s8, 1 }
 0x76f   : > { %v3567_v25 = vpop.eup %3566 }
 0x770   : > { %v1510_v26 = vsel %vm1479_vm3, %v3567_v25, 0.0 }
 0x771   : > { %1511 = vadd.xlane.f32.xlu0 %v1510_v26 }
 0x77a   : > { %1280 = vrot.lane.b32.xlu1 %v4329_v16, %s3890_s5 }
 0x77f   : > { %v1506_v33 = vpop.xlane.xlu0 %1505 }
 0x780   : > { %3568 = vrcp.f32 %v1506_v33 }
 0x781   : > { %3570 = vpow2.f32 %v1502_v35 }
 0x787   : > { %1277 = vrot.lane.b32.xlu0 %v4329_v16, %s3889_s3 }
 0x78d   : > { %v3569_v1 = vpop.eup %3568 }
 0x78e   : > { %v1520_v36 = vmul.f32 %v3569_v1, %v3563_v13  ;;  %v3571_v38 = vpop.eup %3570 }
 0x78f   : > { %v1513_v39 = vsel %vm1479_vm3, %v3571_v38, 0.0 }
 0x790   : > { %v1524_v37 = vpack.c.bf16 %v1520_v36, %v1520_v36 }
 0x792   : > { %3200 = vmatmul.mubr.msk.bf16.vlgmr.msra.gmra.mxu0 %vm1479_vm3, %v1524_v37 }
 0x793   : > { %3211 = vmatprep.mubr.msk.bf16.mxu0 %vm3888_vm0, %v3887_v31 }
 0x79e   : > { %1514 = vadd.xlane.f32.xlu1 %v1513_v39 }
 0x7af   : > { %1283 = vrot.lane.b32.xlu1 %v4329_v16, %s3891_s18 }
 0x7f2   : > { %v1509_v40 = vpop.xlane.xlu1 %1508 }
 0x7f3   : > { %3572 = vrcp.f32 %v1509_v40 }
 0x7f6   : > { %v1281_v41 = vpop.permute.xlu1 %1280 }
 0x7f7   : > { %v1530_v42 = vpack.c.bf16 %v1281_v41, %v1281_v41 }
 0x7f9   : > { %v1629_v43 = vsel %vm1535_vm1, %v1530_v42, 0 }
 0x7fa   : > { %3210 = vmatpush3.bf16.msra.mxu0 %v1629_v43  ;;  %v1512_v44 = vpop.xlane.xlu0 %1511 }
 0x7fb   : > { %3574 = vrcp.f32 %v1512_v44  ;;  %3221 = vmatprep.subr.bf16.mxu0 %v3887_v31 }
 0x7fe   : > { %v1278_v45 = vpop.permute.xlu0 %1277 }
 0x7ff   : > { %v1529_v46 = vpack.c.bf16 %v1278_v45, %v1278_v45 }
 0x800   : > { %v3573_v47 = vpop.eup %3572 }
 0x801   : > { %v1583_v48 = vsel %vm1535_vm1, %v1529_v46, 0  ;;  %v1521_v49 = vmul.f32 %v3573_v47, %v3565_v22  ;;  %v3478_v46 = vld [vmem:[%s4164_s2 + $0x70] ss:$8 sps:$4 sm:$0xff]   ;;  %v3480_v47 = vld [vmem:[%s4164_s2 + $0x74] ss:$8 sps:$4 sm:$0xff]  }
 0x802   : > { %3204 = vmatpush3.bf16.msra.mxu1 %v1583_v48  ;;  %v3483_v48 = vld [vmem:[%s4164_s2 + $0x64] ss:$8 sps:$4 sm:$0xff]  }
 0x803   : > { %v1525_v50 = vpack.c.bf16 %v1521_v49, %v1521_v49  ;;  %3215 = vmatprep.subr.bf16.mxu1 %v3887_v31  ;;  %v3481_v49 = vld [vmem:[%s4164_s2 + $0x60] ss:$8 sps:$4 sm:$0xff]  }
 0x805   : > { %3206 = vmatmul.mubr.msk.bf16.vlgmr.msra.gmra.mxu1 %vm1479_vm3, %v1525_v50 }
 0x806   : > { %3217 = vmatprep.mubr.msk.bf16.mxu1 %vm3888_vm0, %v3887_v31 }
 0x808   : > { %v3575_v16 = vpop.eup %3574 }
 0x809   : > { %v1522_v51 = vmul.f32 %v3575_v16, %v3567_v25 }
 0x80b   : > { %v1526_v52 = vpack.c.bf16 %v1522_v51, %v1522_v51 }
 0x80d   : > { %3212 = vmatmul.mubr.msk.bf16.vlgmr.msra.gmra.mxu0 %vm1479_vm3, %v1526_v52  ;;  %v3486_v52 = vld [vmem:[%s4164_s2 + $0x54] ss:$8 sps:$4 sm:$0xff]  }
 0x80e   : > { %3237 = vmatprep.mubr.msk.bf16.mxu0 %vm3888_vm0, %v3887_v31  ;;  %3222 = vmatpush3.bf16.msra.mxu0 %v3470_v4 }
 0x80f   : > { %3223 = vmatprep.subr.bf16.mxu0 %v3887_v31 }
 0x812   : > { %3224 = vmatpush3.bf16.msra.mxu0 %v3471_v5 }
 0x813   : > { %3225 = vmatprep.subr.bf16.mxu0 %v3887_v31 }
 0x816   : > { %3226 = vmatpush3.bf16.msra.mxu0 %v3472_v9 }
 0x817   : > { %3227 = vmatprep.subr.bf16.mxu0 %v3887_v31 }
 0x81a   : > { %3228 = vmatpush3.bf16.msra.mxu0 %v3473_v12 }
 0x81b   : > { %3229 = vmatprep.subr.bf16.mxu0 %v3887_v31 }
 0x81e   : > { %3230 = vmatpush3.bf16.msra.mxu0 %v3474_v15  ;;  %v3502_v15 = vld [vmem:[%s4198_s28 + $0x38] sm:$0xff]  }
 0x81f   : > { %3231 = vmatprep.subr.bf16.mxu0 %v3887_v31 }
 0x822   : > { %3232 = vmatpush3.bf16.msra.mxu0 %v3475_v20  ;;  %v3505_v20 = vld [vmem:[%s4198_s28 + $0x20] sm:$0xff]  }
 0x823   : > { %3233 = vmatprep.subr.bf16.mxu0 %v3887_v31 }
 0x826   : > { %3234 = vmatpush3.bf16.msra.mxu0 %v3476_v21  ;;  %v3506_v21 = vld [vmem:[%s4198_s28 + $0x18] sm:$0xff]  }
 0x827   : > { %v1515_v53 = vpop.xlane.xlu1 %1514  ;;  %3235 = vmatprep.subr.bf16.mxu0 %v3887_v31 }
 0x828   : > { %3576 = vrcp.f32 %v1515_v53  ;;  %v3484_v53 = vld [vmem:[%s4164_s2 + $0x50] ss:$8 sps:$4 sm:$0xff]  }
 0x82a   : > { %3236 = vmatpush3.bf16.msra.mxu0 %v3477_v29  ;;  %v3508_v29 = vld [vmem:[%s4198_s28 + $0x8] sm:$0xff]  }
 0x82b   : > { %v1284_v54 = vpop.permute.xlu1 %1283  ;;  %3241 = vmatprep.subr.bf16.mxu0 %v3887_v31 }
 0x82c   : > { %v1531_v56 = vpack.c.bf16 %v1284_v54, %v1284_v54  ;;  %v3487_v54 = vld [vmem:[%s4164_s2 + $0x40] ss:$8 sps:$4 sm:$0xff]  }
 0x82e   : > { %v1675_v57 = vsel %vm1535_vm1, %v1531_v56, 0  ;;  %v3489_v56 = vld [vmem:[%s4164_s2 + $0x44] ss:$8 sps:$4 sm:$0xff]  }
 0x82f   : > { %3216 = vmatpush3.bf16.msra.mxu1 %v1675_v57  ;;  %v3492_v57 = vld [vmem:[%s4164_s2 + $0x34] ss:$8 sps:$4 sm:$0xff]  }
 0x830   : > { %1963 = vmatprep.subr.bf16.mxu1 %v3480_v47 }
 0x835   : > { %v3577_v58 = vpop.eup %3576 }
 0x836   : > { %v1523_v59 = vmul.f32 %v3577_v58, %v3571_v38  ;;  %v4414_v38 = vld [vmem:[%s4186_s1 + $0x8] sm:$0xff]  ;;  %v3490_v58 = vld [vmem:[%s4164_s2 + $0x30] ss:$8 sps:$4 sm:$0xff]  }
 0x837   : > { %v1843_v39 = vrot.slane %v4414_v38, %v4226_v28 }
 0x838   : > { %v1527_v60 = vpack.c.bf16 %v1523_v59, %v1523_v59  ;;  %v3495_v59 = vld [vmem:[%s4164_s2 + $0x24] ss:$8 sps:$4 sm:$0xff]  }
 0x83a   : > { %3218 = vmatmul.mubr.msk.bf16.vlgmr.msra.gmra.mxu1 %vm1479_vm3, %v1527_v60  ;;  %v3493_v60 = vld [vmem:[%s4164_s2 + $0x20] ss:$8 sps:$4 sm:$0xff]  }
 0x83b   : > { %1995 = vmatprep.mubr.bf16.mxu1 %v3886_v17  ;;  %1964 = vmatpush1.bf16.msra.mxu1 %v3478_v46  ;;  %v2036_v46 = vrot.slane %v4414_v38, %v4321_v7 }
 0x83c   : > { %1965 = vmatprep.subr.bf16.mxu1 %v3483_v48 }
 0x83f   : > { %1966 = vmatpush1.bf16.msra.mxu1 %v3481_v49 }
 0x840   : > { %1967 = vmatprep.subr.bf16.mxu1 %v3486_v52 }
 0x843   : > { %1968 = vmatpush1.bf16.msra.mxu1 %v3484_v53 }
 0x844   : > { %1969 = vmatprep.subr.bf16.mxu1 %v3489_v56 }
 0x847   : > { %1970 = vmatpush1.bf16.msra.mxu1 %v3487_v54 }
 0x848   : > { %1971 = vmatprep.subr.bf16.mxu1 %v3492_v57 }
 0x84b   : > { %1972 = vmatpush1.bf16.msra.mxu1 %v3490_v58 }
 0x84c   : > { %1973 = vmatprep.subr.bf16.mxu1 %v3495_v59 }
 0x84f   : > { %1974 = vmatpush1.bf16.msra.mxu1 %v3493_v60 }
 0x852   : > { %v1573_v63 = vpop.f32.mrf.mxu0 }
 0x854   : > { %v3201_v0 = vpop.f32.mrf.mxu0 }
 0x855   : > { %v3496_v0 = vld [vmem:[%s4164_s2 + $0x10] ss:$8 sps:$4 sm:$0xff]  }
 0x856   : > { %v1576_v2 = vpop.f32.mrf.mxu0 }
 0x857   : > { %v3501_v2 = vld [vmem:[%s4164_s2 + $0x4] ss:$8 sps:$4 sm:$0xff]  }
 0x858   : > { %v3202_v3 = vpop.f32.mrf.mxu0 }
 0x859   : > { %v3499_v3 = vld [vmem:[%s4164_s2] ss:$8 sps:$4 sm:$0xff]  }
 0x8c5   : > { %v1619_v6 = vpop.f32.mrf.mxu1 }
 0x8c6   : > { %1718 = vrot.lane.b32.xlu1 %v1619_v6, %s3891_s18 }
 0x8c7   : > { %v3207_v8 = vpop.f32.mrf.mxu1 }
 0x8c8   : > { %v1859_v8 = vrot.slane %v4414_v38, %v4232_v30 }
 0x8c9   : > { %v1622_v10 = vpop.f32.mrf.mxu1 }
 0x8cb   : > { %v3208_v11 = vpop.f32.mrf.mxu1 }
 0x8cc   : > { %v1864_v11 = vrot.slane %v4414_v38, %v4257_v55 }
 0x8cd   : > { %v1665_v13 = vpop.f32.mrf.mxu0 }
 0x8ce   : > { %1722 = vrot.lane.b32.xlu0 %v1665_v13, %s3890_s5 }
 0x8cf   : > { %v3213_v14 = vpop.f32.mrf.mxu0 }
 0x8d1   : > { %v1668_v18 = vpop.f32.mrf.mxu0 }
 0x8d2   : > { %v3503_v18 = vld [vmem:[%s4198_s28 + $0x30] sm:$0xff]  }
 0x8d3   : > { %v3214_v19 = vpop.f32.mrf.mxu0 }
 0x8d4   : > { %v3504_v19 = vld [vmem:[%s4198_s28 + $0x28] sm:$0xff]  }
 0x8fa   : > { %v1711_v22 = vpop.f32.mrf.mxu1 }
 0x8fb   : > { %1726 = vrot.lane.b32.xlu1 %v1711_v22, %s3889_s3  ;;  %v3509_v22 = vld [vmem:[%s4198_s28] sm:$0xff]  }
 0x8fc   : > { %v3219_v23 = vpop.f32.mrf.mxu1 }
 0x8fd   : > { %v2012_v23 = vrot.slane %v4414_v38, %v4310_v62 }
 0x8fe   : > { %v1714_v25 = vpop.f32.mrf.mxu1 }
 0x900   : > { %v3220_v26 = vpop.f32.mrf.mxu1 }
 0x938   : > { %v1719_v32 = vpop.permute.xlu1 %1718 }
 0x939   : > { %v1729_v34 = vsel %vm1294_vm2, %v1573_v63, %v1719_v32  ;;  %v3498_v63 = vld [vmem:[%s4164_s2 + $0x14] ss:$8 sps:$4 sm:$0xff]  }
 0x93a   : > { %1975 = vmatprep.subr.bf16.mxu1 %v3498_v63 }
 0x93b   : > { %1976 = vmatpush1.bf16.msra.mxu1 %v3496_v0 }
 0x93c   : > { %1977 = vmatprep.subr.bf16.mxu1 %v3501_v2 }
 0x93f   : > { %1978 = vmatpush1.bf16.msra.mxu1 %v3499_v3 }
 0x940   : > { %v1723_v33 = vpop.permute.xlu0 %1722 }
 0x941   : > { %v1731_v35 = vsel %vm1730_vm4, %v1729_v34, %v1723_v33 }
 0x96d   : > { %v1727_v1 = vpop.permute.xlu1 %1726 }
 0x96e   : > { %v1733_v36 = vsel %vm1732_vm5, %v1731_v35, %v1727_v1 }
 0x96f   : > { %v1750_v37 = vpack.c.bf16 %v1733_v36, %v1733_v36 }
 0x971   : > { %3238 = vmatmul.mubr.bf16.vlgmr.msra.gmra.mxu0 %v1750_v37  ;;  %v4462_v37 = vld [vmem:[%s4186_s1 + $0x10] sm:$0xff] }
 0x972   : > { %3257 = vmatprep.mubr.msk.bf16.mxu0 %vm3888_vm0, %v3887_v31  ;;  %3242 = vmatpush3.bf16.msra.mxu0 %v3502_v15  ;;  %v2053_v56 = vrot.slane %v4462_v37, %v4226_v28  ;;  %v2058_v59 = vrot.slane %v4462_v37, %v4307_v61  ;;  %v2075_v3 = vrot.slane %v4462_v37, %v4257_v55 }
 0x973   : > { %3243 = vmatprep.subr.bf16.mxu0 %v3887_v31 }
 0x976   : > { %3244 = vmatpush3.bf16.msra.mxu0 %v3503_v18 }
 0x977   : > { %3245 = vmatprep.subr.bf16.mxu0 %v3887_v31 }
 0x97a   : > { %3246 = vmatpush3.bf16.msra.mxu0 %v3504_v19 }
 0x97b   : > { %3247 = vmatprep.subr.bf16.mxu0 %v3887_v31 }
 0x97e   : > { %3248 = vmatpush3.bf16.msra.mxu0 %v3505_v20 }
 0x97f   : > { %3249 = vmatprep.subr.bf16.mxu0 %v3887_v31 }
 0x982   : > { %3250 = vmatpush3.bf16.msra.mxu0 %v3506_v21 }
 0x983   : > { %3251 = vmatprep.subr.bf16.mxu0 %v3887_v31 }
 0xa31   : > { %v1833_v40 = vpop.f32.mrf.mxu0 }
 0xa32   : > { %v1839_v41 = vadd.f32 %v1833_v40, %v4266_v24  ;;  %v2040_v40 = vsub.s32 6, %v4223_v27 }
 0xa33   : > { %v3239_v42 = vpop.f32.mrf.mxu0 }
 0xa34   : > { %v4419_v43 = vadd.f32 %v1843_v39, %v1839_v41  ;;  %v2060_v39 = vadd.f32 1e-05, %v4462_v37  ;;  %v2041_v47 = vrot.slane %v4414_v38, %v2040_v40 }
 0xa35   : > { %v1836_v44 = vpop.f32.mrf.mxu0 }
 0xa36   : > { %1845 = vadd.xlane.f32.xlu0 %v4419_v43  ;;  %v2046_v44 = vsub.s32 7, %v4223_v27  ;;  %v3538_v27 = vld [vmem:[%s4154_s9 + $0xe8] sm:$0xff]  }
 0xa37   : > { %v3240_v45 = vpop.f32.mrf.mxu0 }
 0xabf   : > { %v1846_v24 = vpop.xlane.xlu0 %1845 }
 0xac0   : > { %v1847_v50 = vmul.f32 0.0078125, %v1846_v24  ;;  %v2047_v24 = vrot.slane %v4414_v38, %v2046_v44 }
 0xac2   : > { %v1848_v16 = vsub.f32 %v4419_v43, %v1847_v50 }
 0xac4   : > { %v1849_v51 = vmul.f32 %v1848_v16, %v1848_v16 }
 0xac6   : > { %1850 = vadd.xlane.f32.xlu1 %v1849_v51 }
 0xb4f   : > { %v1851_v4 = vpop.xlane.xlu1 %1850 }
 0xb50   : > { %v1852_v5 = vmul.f32 0.0078125, %v1851_v4 }
 0xb52   : > { %v1853_v6 = vadd.f32 1e-05, %v1852_v5 }
 0xb54   : > { %3578 = vrsqrt.f32 %v1853_v6 }
 0xb61   : > { %v3579_v9 = vpop.eup %3578 }
 0xb62   : > { %v1855_v10 = vmul.f32 %v3579_v9, %v1848_v16 }
 0xb64   : > { %v1860_v12 = vmul.f32 %v1859_v8, %v1855_v10 }
 0xb66   : > { %v1865_v13 = vadd.f32 %v1864_v11, %v1860_v12 }
 0xb68   : > { %v1882_v14 = vpack.c.bf16 %v1865_v13, %v1865_v13  ;;  %v2193_v13 = vrot.slane %v4462_v37, %v4321_v7  ;;  %v3513_v7 = vld [vmem:[%s4147_s16 + $0xe0] ss:$8 sps:$4 sm:$0xff]  }
 0xb6a   : > { %1996 = vmatmul.mubr.bf16.vlgmr.msra.gmra.mxu1 %v1882_v14 }
 0xb6b   : > { %2364 = vmatprep.mubr.bf16.mxu1 %v3886_v17  ;;  %v3507_v17 = vld [vmem:[%s4198_s28 + $0x10] sm:$0xff]  }
 0xb6c   : > { %3252 = vmatpush3.bf16.msra.mxu0 %v3507_v17  ;;  %v3510_v17 = vld [vmem:[%s4147_s16 + $0xf0] ss:$8 sps:$4 sm:$0xff]  }
 0xb6d   : > { %3253 = vmatprep.subr.bf16.mxu0 %v3887_v31 }
 0xb70   : > { %3254 = vmatpush3.bf16.msra.mxu0 %v3508_v29  ;;  %v3512_v29 = vld [vmem:[%s4147_s16 + $0xf4] ss:$8 sps:$4 sm:$0xff]  }
 0xb71   : > { %3255 = vmatprep.subr.bf16.mxu0 %v3887_v31  ;;  %v2007_v31 = vrot.slane %v4414_v38, %v4307_v61  ;;  %v2070_v38 = vrot.slane %v4462_v37, %v4232_v30  ;;  %2332 = vmatprep.subr.bf16.mxu1 %v3512_v29 }
 0xb72   : > { %2333 = vmatpush1.bf16.msra.mxu1 %v3510_v17 }
 0xb74   : > { %3256 = vmatpush3.bf16.msra.mxu0 %v3509_v22  ;;  %v3515_v22 = vld [vmem:[%s4147_s16 + $0xe4] ss:$8 sps:$4 sm:$0xff]  }
 0xb75   : > { %2334 = vmatprep.subr.bf16.mxu1 %v3515_v22 }
 0xb76   : > { %2335 = vmatpush1.bf16.msra.mxu1 %v3513_v7 }
 0xc2a   : > { %v1997_v25 = vpop.f32.mrf.mxu1 }
 0xc2b   : > { %v2008_v41 = vadd.f32 %v2007_v31, %v1997_v25  ;;  %v3525_v31 = vld [vmem:[%s4147_s16 + $0xa0] ss:$8 sps:$4 sm:$0xff]  }
 0xc2c   : > { %v1999_v26 = vpop.f32.mrf.mxu1 }
 0xc2d   : > { %v2013_v32 = vadd.f32 %v2012_v23, %v1999_v26 }
 0xc2e   : > { %v2001_v33 = vpop.f32.mrf.mxu1 }
 0xc2f   : > { %v2962_v34 = vmul.f32 -1.442695, %v2013_v32  ;;  %v3518_v32 = vld [vmem:[%s4147_s16 + $0xd4] ss:$8 sps:$4 sm:$0xff]   ;;  %v3516_v33 = vld [vmem:[%s4147_s16 + $0xd0] ss:$8 sps:$4 sm:$0xff]  }
 0xc30   : > { %v2002_v35 = vpop.f32.mrf.mxu1  ;;  %2336 = vmatprep.subr.bf16.mxu1 %v3518_v32 }
 0xc31   : > { %3580 = vpow2.f32 %v2962_v34  ;;  %2337 = vmatpush1.bf16.msra.mxu1 %v3516_v33  ;;  %v3519_v34 = vld [vmem:[%s4147_s16 + $0xc0] ss:$8 sps:$4 sm:$0xff]   ;;  %v3521_v35 = vld [vmem:[%s4147_s16 + $0xc4] ss:$8 sps:$4 sm:$0xff]  }
 0xc32   : > { %2338 = vmatprep.subr.bf16.mxu1 %v3521_v35  ;;  %v605_v35 = vld [vmem:[%s4186_s1 + $0x18] sm:$0x1f] }
 0xc35   : > { %2339 = vmatpush1.bf16.msra.mxu1 %v3519_v34 }
 0xc3e   : > { %v3581_v1 = vpop.eup %3580 }
 0xc3f   : > { %v2017_v36 = vadd.f32 1.0, %v3581_v1  ;;  %v3524_v1 = vld [vmem:[%s4147_s16 + $0xb4] ss:$8 sps:$4 sm:$0xff]  }
 0xc40   : > { %2340 = vmatprep.subr.bf16.mxu1 %v3524_v1 }
 0xc41   : > { %3582 = vrcp.f32 %v2017_v36  ;;  %v3522_v36 = vld [vmem:[%s4147_s16 + $0xb0] ss:$8 sps:$4 sm:$0xff]  }
 0xc42   : > { %3584 = vrsqrt.f32 %v2060_v39  ;;  %v3527_v39 = vld [vmem:[%s4147_s16 + $0xa4] ss:$8 sps:$4 sm:$0xff]   ;;  %2341 = vmatpush1.bf16.msra.mxu1 %v3522_v36  ;;  %v2425_v36 = vrot.slane %v605_v35, %v4226_v28  ;;  %v2578_v28 = vrot.slane %v605_v35, %v4232_v30 }
 0xc43   : > { %2342 = vmatprep.subr.bf16.mxu1 %v3527_v39 }
 0xc46   : > { %2343 = vmatpush1.bf16.msra.mxu1 %v3525_v31 }
 0xc4e   : > { %v3583_v42 = vpop.eup %3582 }
 0xc4f   : > { %v2020_v45 = vmul.f32 %v3583_v42, %v2008_v41  ;;  %v3585_v57 = vpop.eup %3584  ;;  %v3530_v41 = vld [vmem:[%s4147_s16 + $0x94] ss:$8 sps:$4 sm:$0xff]   ;;  %v3528_v42 = vld [vmem:[%s4147_s16 + $0x90] ss:$8 sps:$4 sm:$0xff]  }
 0xc50   : > { %v2065_v63 = vrot.slane %v3585_v57, %v4310_v62  ;;  %2344 = vmatprep.subr.bf16.mxu1 %v3530_v41  ;;  %v3535_v57 = vld [vmem:[%s4154_s9 + $0xb8] sm:$0xff]  }
 0xc51   : > { %v2024_v48 = vrot.slane %v2020_v45, 7  ;;  %v2029_v49 = vrot.slane %v2020_v45, 1  ;;  %v2042_v52 = vmul.f32 %v2041_v47, %v2020_v45  ;;  %v3533_v45 = vld [vmem:[%s4147_s16 + $0x84] ss:$8 sps:$4 sm:$0xff]   ;;  %2345 = vmatpush1.bf16.msra.mxu1 %v3528_v42 }
 0xc52   : > { %2346 = vmatprep.subr.bf16.mxu1 %v3533_v45 }
 0xc53   : > { %v2027_v50 = vsel %vm2023_vm6, 0.0, %v2024_v48  ;;  %v2032_v16 = vsel %vm2028_vm7, 0.0, %v2029_v49 }
 0xc54   : > { %v2037_v51 = vmul.f32 %v2036_v46, %v2027_v50  ;;  %v2048_v54 = vmul.f32 %v2047_v24, %v2032_v16  ;;  %v3531_v46 = vld [vmem:[%s4147_s16 + $0x80] ss:$8 sps:$4 sm:$0xff]   ;;  %v2209_v24 = vrot.slane %v4462_v37, %v2040_v40  ;;  %v3536_v40 = vld [vmem:[%s4154_s9 + $0xf0] sm:$0xff]  }
 0xc55   : > { %2347 = vmatpush1.bf16.msra.mxu1 %v3531_v46 }
 0xc56   : > { %v2043_v53 = vadd.f32 %v2042_v52, %v2037_v51  ;;  %v2214_v51 = vrot.slane %v4462_v37, %v2046_v44  ;;  %v3539_v37 = vld [vmem:[%s4154_s9 + $0xa8] sm:$0xff]   ;;  %v3540_v44 = vld [vmem:[%s4154_s9 + $0xe0] sm:$0xff]  }
 0xc58   : > { %v2049_v58 = vadd.f32 %v2048_v54, %v2043_v53 }
 0xc5a   : > { %v2054_v60 = vadd.f32 %v2053_v56, %v2049_v58  ;;  %v3534_v56 = vld [vmem:[%s4154_s9 + $0xf8] sm:$0xff]   ;;  %v3537_v58 = vld [vmem:[%s4154_s9 + $0xb0] sm:$0xff]  }
 0xc5b   : > { %3131 = vmatprep.subr.bf16.mxu0 %v3534_v56 }
 0xc5c   : > { %v2059_v0 = vsub.f32 %v2054_v60, %v2058_v59  ;;  %v3541_v59 = vld [vmem:[%s4154_s9 + $0xa0] sm:$0xff]   ;;  %v3542_v60 = vld [vmem:[%s4154_s9 + $0xd8] sm:$0xff]  }
 0xc5e   : > { %v2066_v2 = vmul.f32 %v2065_v63, %v2059_v0  ;;  %v3543_v63 = vld [vmem:[%s4154_s9 + $0x98] sm:$0xff]   ;;  %v3544_v0 = vld [vmem:[%s4154_s9 + $0xd0] sm:$0xff]  }
 0xc60   : > { %v2071_v4 = vmul.f32 %v2070_v38, %v2066_v2  ;;  %v3545_v38 = vld [vmem:[%s4154_s9 + $0x90] sm:$0xff]   ;;  %v3546_v2 = vld [vmem:[%s4154_s9 + $0xc8] sm:$0xff]  }
 0xc62   : > { %v2076_v5 = vadd.f32 %v2075_v3, %v2071_v4  ;;  %v3547_v3 = vld [vmem:[%s4154_s9 + $0x88] sm:$0xff]   ;;  %v3548_v4 = vld [vmem:[%s4154_s9 + $0xc0] sm:$0xff]  }
 0xc64   : > { %v2963_v6 = vmul.f32 -1.442695, %v2076_v5 }
 0xc66   : > { %3586 = vpow2.f32 %v2963_v6  ;;  %v3602_v6 = vld [vmem:[%s4191_s27] sm:$0xf] }
 0xc73   : > { %v3587_v8 = vpop.eup %3586 }
 0xc74   : > { %v2080_v9 = vadd.f32 1.0, %v3587_v8  ;;  %v2237_v8 = vrot.slane %v3602_v6, %v4232_v30 }
 0xc76   : > { %3588 = vrcp.f32 %v2080_v9  ;;  %v2241_v9 = vrot.slane %v3602_v6, %v4307_v61 }
 0xc83   : > { %v3589_v10 = vpop.eup %3588 }
 0xc84   : > { %v2083_v11 = vmul.f32 %v3589_v10, %v2076_v5  ;;  %v3549_v5 = vld [vmem:[%s4154_s9 + $0x80] sm:$0xff]   ;;  %v2247_v10 = vrot.slane %v2237_v8, %v4232_v30 }
 0xc86   : > { %v2100_v12 = vpack.c.bf16 %v2083_v11, %v2083_v11  ;;  %v2251_v11 = vrot.slane %v2241_v9, %v4232_v30 }
 0xc88   : > { %3258 = vmatmul.mubr.bf16.vlgmr.msra.gmra.mxu0 %v2100_v12 }
 0xc89   : > { %3132 = vmatpush3.bf16.msra.mxu0 %v3535_v57 }
 0xc8a   : > { %3133 = vmatprep.subr.bf16.mxu0 %v3536_v40 }
 0xc8d   : > { %3134 = vmatpush3.bf16.msra.mxu0 %v3537_v58 }
 0xc8e   : > { %3135 = vmatprep.subr.bf16.mxu0 %v3538_v27 }
 0xc91   : > { %3136 = vmatpush3.bf16.msra.mxu0 %v3539_v37 }
 0xc92   : > { %3137 = vmatprep.subr.bf16.mxu0 %v3540_v44 }
 0xc95   : > { %3138 = vmatpush3.bf16.msra.mxu0 %v3541_v59 }
 0xc96   : > { %3139 = vmatprep.subr.bf16.mxu0 %v3542_v60 }
 0xc99   : > { %3140 = vmatpush3.bf16.msra.mxu0 %v3543_v63 }
 0xc9a   : > { %3141 = vmatprep.subr.bf16.mxu0 %v3544_v0 }
 0xc9d   : > { %3142 = vmatpush3.bf16.msra.mxu0 %v3545_v38 }
 0xc9e   : > { %3143 = vmatprep.subr.bf16.mxu0 %v3546_v2 }
 0xca1   : > { %3144 = vmatpush3.bf16.msra.mxu0 %v3547_v3 }
 0xca2   : > { %3145 = vmatprep.subr.bf16.mxu0 %v3548_v4 }
 0xca5   : > { %3146 = vmatpush3.bf16.msra.mxu0 %v3549_v5 }
 0xd48   : > { %v2183_v14 = vpop.f32.mrf.mxu0 }
 0xd49   : > { %v2189_v15 = vadd.f32 %v2183_v14, %v4419_v43 }
 0xd4a   : > { %v3259_v18 = vpop.f32.mrf.mxu0 }
 0xd4b   : > { %v4491_v19 = vadd.f32 %v2193_v13, %v2189_v15 }
 0xd4c   : > { %v2186_v20 = vpop.f32.mrf.mxu0 }
 0xd4d   : > { %2195 = vadd.xlane.f32.xlu0 %v4491_v19 }
 0xd4e   : > { %v3260_v21 = vpop.f32.mrf.mxu0 }
 0xdd6   : > { %v2196_v43 = vpop.xlane.xlu0 %2195 }
 0xdd7   : > { %v2197_v23 = vmul.f32 0.0078125, %v2196_v43 }
 0xdd9   : > { %v2198_v25 = vsub.f32 %v4491_v19, %v2197_v23 }
 0xddb   : > { %v2199_v26 = vmul.f32 %v2198_v25, %v2198_v25 }
 0xddd   : > { %2200 = vadd.xlane.f32.xlu0 %v2199_v26 }
 0xe66   : > { %v2201_v47 = vpop.xlane.xlu0 %2200 }
 0xe67   : > { %v2202_v48 = vmul.f32 0.0078125, %v2201_v47 }
 0xe69   : > { %v2203_v49 = vadd.f32 1e-05, %v2202_v48 }
 0xe6b   : > { %3590 = vrsqrt.f32 %v2203_v49 }
 0xe78   : > { %v3591_v50 = vpop.eup %3590 }
 0xe79   : > { %v2205_v16 = vmul.f32 %v3591_v50, %v2198_v25 }
 0xe7b   : > { %v2210_v52 = vmul.f32 %v2209_v24, %v2205_v16 }
 0xe7d   : > { %v2215_v53 = vadd.f32 %v2214_v51, %v2210_v52 }
 0xe7f   : > { %v2233_v54 = vpack.c.bf16 %v2215_v53, %v2215_v53 }
 0xe81   : > { %2365 = vmatmul.mubr.bf16.vlgmr.msra.gmra.mxu1 %v2233_v54  ;;  %v2583_v54 = vrot.slane %v605_v35, %v4257_v55 }
 0xf41   : > { %v2366_v12 = vpop.f32.mrf.mxu1 }
 0xf42   : > { %v2367_v13 = vadd.f32 %v2366_v12, %v2247_v10 }
 0xf43   : > { %v2368_v14 = vpop.f32.mrf.mxu1 }
 0xf44   : > { %v3004_v15 = vmul.f32 -1.442695, %v2367_v13  ;;  %v2369_v18 = vadd.f32 %v2368_v14, %v2251_v11 }
 0xf45   : > { %v2370_v20 = vpop.f32.mrf.mxu1 }
 0xf46   : > { %3592 = vpow2.f32 %v3004_v15  ;;  %v3005_v21 = vmul.f32 -1.442695, %v2369_v18 }
 0xf47   : > { %v2371_v17 = vpop.f32.mrf.mxu1 }
 0xf48   : > { %3594 = vpow2.f32 %v3005_v21 }
 0xf53   : > { %v3593_v29 = vpop.eup %3592 }
 0xf54   : > { %v2379_v22 = vadd.f32 1.0, %v3593_v29 }
 0xf55   : > { %v3595_v7 = vpop.eup %3594 }
 0xf56   : > { %3596 = vrcp.f32 %v2379_v22  ;;  %v2380_v43 = vadd.f32 1.0, %v3595_v7 }
 0xf58   : > { %3598 = vrcp.f32 %v2380_v43 }
 0xf63   : > { %v3597_v23 = vpop.eup %3596 }
 0xf64   : > { %v2385_v26 = vmul.f32 %v3597_v23, %v2367_v13 }
 0xf65   : > { %v3599_v25 = vpop.eup %3598 }
 0xf66   : > { %v2386_v32 = vmul.f32 %v3599_v25, %v2369_v18  ;;  %v2420_v34 = vpack.c.bf16 %v2385_v26, %v2385_v26 }
 0xf68   : > { %v2421_v33 = vpack.c.bf16 %v2386_v32, %v2386_v32 }
 0xf6a   : > { %2554 = vmatprep.mubr.bf16.mxu0 %v2421_v33 }
 0xf6b   : > { %2555 = vmatmul.mubr.bf16.vlgmr.msra.gmra.mxu0 %v2420_v34 }
0x102b   : > { %v3147_v1 = vpop.f32.mrf.mxu0 }
0x102d   : > { %v3148_v39 = vpop.f32.mrf.mxu0 }
0x102e   : > { %v3149_v31 = vadd.f32 %v3148_v39, %v3147_v1 }
0x102f   : > { %v3150_v41 = vpop.f32.mrf.mxu0 }
0x1030   : > { %v2557_v42 = vadd.f32 %v3149_v31, %v2425_v36 }
0x1031   : > { %v3151_v45 = vpop.f32.mrf.mxu0 }
0x1032   : > { %v2562_v46 = vmul.f32 0.5, %v2557_v42 }
0x1034   : > { %v2563_v47 = vadd.f32 %v2562_v46, %v4491_v19 }
0x1036   : > { %2564 = vadd.xlane.f32.xlu0 %v2563_v47 }
0x10bf   : > { %v2565_v48 = vpop.xlane.xlu0 %2564 }
0x10c0   : > { %v2566_v49 = vmul.f32 0.0078125, %v2565_v48 }
0x10c2   : > { %v2567_v24 = vsub.f32 %v2563_v47, %v2566_v49 }
0x10c4   : > { %v2568_v50 = vmul.f32 %v2567_v24, %v2567_v24 }
0x10c6   : > { %2569 = vadd.xlane.f32.xlu1 %v2568_v50 }
0x114f   : > { %v2570_v16 = vpop.xlane.xlu1 %2569 }
0x1150   : > { %v2571_v51 = vmul.f32 0.0078125, %v2570_v16 }
0x1152   : > { %v2572_v52 = vadd.f32 1e-05, %v2571_v51 }
0x1154   : > { %3600 = vrsqrt.f32 %v2572_v52 }
0x1161   : > { %v3601_v53 = vpop.eup %3600 }
0x1162   : > { %v2574_v56 = vmul.f32 %v3601_v53, %v2567_v24 }
0x1164   : > { %v2579_v57 = vmul.f32 %v2578_v28, %v2574_v56  ;;  %2589 = sbr.rel (%p3054_p6) target bundleno = 4764 (0x129c), region = 84 }
0x1166   : > { %v2584_v40 = vadd.f32 %v2583_v54, %v2579_v57 }
0x1168   : > { %2585 = vst [vmem:[#allocation2] sm:$0xff] %v2584_v40 }
0x1169   : > { %2590 = vadd.xlane.f32.xlu0 %v2584_v40  ;;  %v2604_v55 = vrot.slane %v605_v35, %v4307_v61  ;;  %v2609_v0 = vrot.slane %v605_v35, %v4310_v62 }
0x11f2   : > { %v2591_v19 = vpop.xlane.xlu0 %2590 }
0x11f3   : > { %v2592_v58 = vmul.f32 0.0078125, %v2591_v19 }
0x11f5   : > { %v2593_v27 = vsub.f32 %v2584_v40, %v2592_v58 }
0x11f7   : > { %v2594_v37 = vmul.f32 %v2593_v27, %v2593_v27 }
0x11f9   : > { %2595 = vadd.xlane.f32.xlu0 %v2594_v37 }
0x1282   : > { %v2596_v44 = vpop.xlane.xlu0 %2595 }
0x1283   : > { %v2597_v59 = vmul.f32 0.0078125, %v2596_v44 }
0x1285   : > { %v2598_v30 = vadd.f32 1e-05, %v2597_v59 }
0x1287   : > { %3603 = vrsqrt.f32 %v2598_v30 }
0x1294   : > { %v3604_v60 = vpop.eup %3603 }
0x1295   : > { %v2600_v63 = vmul.f32 %v3604_v60, %v2593_v27 }
0x1297   : > { %v2605_v38 = vmul.f32 %v2604_v55, %v2600_v63 }
0x1299   : > { %v2610_v2 = vadd.f32 %v2609_v0, %v2605_v38 }
0x129b   : > { %2611 = vst [vmem:[%s574_s25] sm:$0xff] %v2610_v2 }
0x129c PF: > { %s4682_s16 = sld [smem:[#allocation21_spill]]  ;;  %s2626_s11 = sshll.u32 %s574_s25, 4  ;;  %s2627_s11 = int_to_ptr.vmem [resolvable:$true] %s2626_s11 }
0x129d   : > { %s4684_s14 = sld [smem:[#allocation39_spill]]  ;;  %s4686_s15 = sand.u32 1, %s3837_s10  }
0x129e   : > { %s2613_s24 = scalar_lea.sflag [#allocation5], %s4686_s15  ;;  %s3745_s29 = scalar_lea.vmem %s2627_s11, 128 }
0x129f   : > { %p3746_p11 = scmp.ne.s32.totalorder %s2627_s11, %s3745_s29  ;;  %s3892_s12 = smov [#allocation12]  }
0x12a0   : > { %s3749_s23 = sshll.u32 %s3892_s12, 4  ;;  %s3750_s23 = int_to_ptr.vmem [resolvable:$false] %s3749_s23 }
0x12a1   : > { %p3747_p13 = pnand %p3746_p11, %p4035_p12  ;;  %s3751_s1 = scalar_lea.vmem %s3750_s23, 256 }
0x12a2   : > { %s3056_s2 = sshll.u32 %s4682_s16, 7  ;;  %p3752_p1 = scmp.lt.s32.totalorder %s2627_s11, %s3750_s23 }
0x12a3   : > { %s4685_s6 = smov %s4684_s14  ;;  %s2624_s21 = scalar_lea.hbm %s4684_s14, %s3056_s2 }
0x12a4   : > { %p3748_p0 = pneg %p3747_p13  ;;  %p3753_p7 = scmp.lt.s32.totalorder %s3751_s1, %s3745_s29 }
0x12a6   : > { %p3754_p9 = por %p3753_p7, %p3752_p1 }
0x12a8   : > { %p3755_p5 = pnand %p3754_p9, %p3748_p0 }
0x12aa   : > { %3758 = shalt.err (!%p3755_p5)
}
0x12ab   : > { %s3759_s26 = scalar_lea.hbm %s2624_s21, 128  ;;  %s3763_s19 = scalar_lea.hbm %s4685_s6, 256 }
0x12ac   : > { %p3760_p10 = scmp.ne.s32.totalorder %s2624_s21, %s3759_s26  ;;  %p3764_p8 = scmp.lt.s32.totalorder %s2624_s21, %s4685_s6 }
0x12ad   : > { %p3765_p6 = scmp.lt.s32.totalorder %s3763_s19, %s3759_s26 }
0x12ae   : > { %p3761_p4 = pnand %p3760_p10, %p4035_p12 }
0x12af   : > { %p3766_p11 = por %p3765_p6, %p3764_p8 }
0x12b0   : > { %p3762_p3 = pneg %p3761_p4 }
0x12b2   : > { %p3767_p13 = pnand %p3766_p11, %p3762_p3 }
0x12b4   : > { %3770 = shalt.err (!%p3767_p13)
}
0x12b5   : > { %3274 = dma.vmem_to_hbm [thread:$0]  (%p4035_p12), %s2627_s11, 128, %s2624_s21, %s2613_s24  }
0x12b6 PF: > { %s4687_s20 = sld [smem:[#allocation23_spill]] }
0x12b7   : > { %s4688_s28 = sld [smem:[#allocation17_spill]] }
0x12bc   : > { %p3297_p0 = scmp.ge.s32.totalorder %s4687_s20, 2 }
0x12bd   : > { %s2638_s3 = sand.u32 1, %s4688_s28  }
0x12be   : > { %p3293_p1 = pnand %p3297_p0, %p4045_p2  ;;  %s2639_s5 = scalar_lea.sflag [#allocation5], %s2638_s3 }
0x12c0   : > { %p3294_p7 = pneg %p3293_p1 }
0x12c2   : > { %3828 = dma.done.wait (%p3294_p7), %s2639_s5, 128  }
0x12c3   : > { %3830 = vsyncadd (%p3294_p7), %s2639_s5, 4294967168  ;;  %s31_s19 = sadd.s32 1, %s4687_s20   ;;  %s4690_s18 = sld [smem:[#allocation18_spill]] }
0x12c4   : > { %p28_p9 = scmp.ge.s32.totalorder %s31_s19, 6   ;;  %s4691_s11 = sld [smem:[#allocation27_spill]] }
0x12c5   : > { %s4692_s8 = sld [smem:[#allocation19_spill]]  ;;  %s4697_s30 = smov %s3837_s10 }
0x12c6   : > { %s4693_s14 = sld [smem:[#allocation26_spill]]  ;;  %s4699_s12 = smov %s3849_s13 }
0x12c7   : > { %s4694_s16 = sld [smem:[#allocation22_spill]]  ;;  %s4701_s15 = smov %s3865_s17 }
0x12c8   : > { %s4695_s9 = sld [smem:[#allocation24_spill]] }
0x12c9   : > { %s4696_s2 = sld [smem:[#allocation25_spill]]  ;;  %s4698_s10 = smov %s4690_s18 }
0x12cb   : > { %s4700_s13 = smov %s4692_s8  ;;  %30 = sbr.rel (!%p28_p9) target bundleno = 24 (0x18), region = 171 }
0x12ce   : > { %s4702_s17 = smov %s4695_s9 }
0x12cf   : > { %s4703_s18 = smov %s4696_s2 }
0x12d0   :  { %2644 = vsyncpa [#allocation4], 1 }
0x12d1   :  { %2646 = vsyncpa [#allocation4 + $0x1], 1 }
0x12d2   :  { %2647 = vsyncpa [#allocation7], 1 }
0x12d3   :  { %2649 = vsyncpa [#allocation7 + $0x1], 1 }
0x12d4   :  { %2650 = vsyncpa [#allocation10], 1 }
0x12d5   :  { %2652 = vsyncpa [#allocation10 + $0x1], 1 }
0x12d6   :  { %2653 = vsyncpa [#allocation5], 1 }
0x12d7   :  { %2655 = vsyncpa [#allocation5 + $0x1], 1 }

</bundles_post_ra>
